<compile_context>
chip_gen: v7x
topology: tpu7x:2x2x1
jax: 0.10.0
libtpu: 0.0.40
codegen_flags: <defaults>
</compile_context>

<pallas_src>
import jax
import jax.numpy as jnp
from jax import lax
from jax.experimental import pallas as pl
from jax.experimental.pallas import tpu as pltpu


def _bottleneck_kernel(x_ref, xtop_ref, xbot_ref,
                       w1_ref, s1_ref, b1_ref,
                       w2_ref, s2_ref, b2_ref,
                       w3_ref, s3_ref, b3_ref,
                       o_ref, tap_ref):
    """Fused bottleneck for one (batch, row-tile) grid step.

    x_ref    : (1, TH, W, Cin) f32    current row tile
    xtop_ref : (1, 1,  W, Cin) f32    row just above the tile (clamped index)
    xbot_ref : (1, 1,  W, Cin) f32    row just below the tile (clamped index)
    w1_ref   : (Cin, P) bf16          conv1 1x1 weights
    w2_ref   : (3, 3, P, P) bf16      conv2 3x3 weights (HWIO)
    w3_ref   : (P, Cin) bf16          conv3 1x1 weights (Cin == 4*P)
    s*/b*    : (1, C) f32             folded BatchNorm scale / bias
    o_ref    : (1, TH, W, Cin) out dtype (bf16 by default)
    tap_ref  : VMEM scratch (3, TH+2, W, P) bf16 -- bn1+relu output shifted by
               dx-1 along W (zero fill at the image's left/right border).
    """
    _, TH, W, Cin = x_ref.shape
    P = w1_ref.shape[1]

    i = pl.program_id(1)
    n_i = pl.num_programs(1)

    # Hoist BN scale / bias loads once per step.
    s1 = s1_ref[...]; b1 = b1_ref[...]
    s2 = s2_ref[...]; b2 = b2_ref[...]
    s3 = s3_ref[...]; b3 = b3_ref[...]

    # ---- conv1 (1x1) + bn1 + relu over tile + 1-row halos, one matmul ------
    x_tile = x_ref[0]                                     # (TH, W, Cin) f32
    x_all = jnp.concatenate([xtop_ref[0], x_tile, xbot_ref[0]], axis=0)
    h1 = jnp.dot(x_all.reshape((TH + 2) * W, Cin).astype(jnp.bfloat16),
                 w1_ref[...], preferred_element_type=jnp.float32)
    h1 = jnp.maximum(h1 * s1 + b1, 0.0).reshape(TH + 2, W, P)

    # Zero the halo rows at the image top/bottom edge (the 3x3 conv zero-pads
    # *after* bn1 + relu, so masking must happen post-activation).
    r = lax.broadcasted_iota(jnp.int32, (TH + 2, 1, 1), 0)
    keep = jnp.logical_and(jnp.logical_or(r > 0, i > 0),
                           jnp.logical_or(r < TH + 1, i < n_i - 1))
    h1 = jnp.where(keep, h1, 0.0).astype(jnp.bfloat16)    # (TH+2, W, P) bf16

    # ---- conv2 (3x3, stride 1, pad 1) as 9 row-aligned matmuls -------------
    # tap_ref[dx] holds h1 shifted by (dx-1) along W with zero fill, so the
    # (dy, dx) tap is the row slab tap_ref[dx, dy:dy+TH]: slices live on a
    # major axis only (no sublane-misaligned windows, no padded-pitch waste).
    zcol = jnp.zeros((TH + 2, 1, P), jnp.bfloat16)
    tap_ref[0] = jnp.concatenate([zcol, h1[:, :W - 1, :]], axis=1)   # w - 1
    tap_ref[1] = h1                                                  # w
    tap_ref[2] = jnp.concatenate([h1[:, 1:, :], zcol], axis=1)       # w + 1

    acc = None
    for dy in range(3):
        for dx in range(3):
            lhs = tap_ref[dx, dy:dy + TH].reshape(TH * W, P)
            term = jnp.dot(lhs, w2_ref[dy, dx],
                           preferred_element_type=jnp.float32)
            acc = term if acc is None else acc + term
    h2 = jnp.maximum(acc * s2 + b2, 0.0)                  # (TH*W, P) f32

    # ---- conv3 (1x1) + bn3 + f32 identity residual + relu ------------------
    h3 = jnp.dot(h2.astype(jnp.bfloat16), w3_ref[...],
                 preferred_element_type=jnp.float32)
    h3 = h3 * s3 + b3                                     # (TH*W, Cin)
    out = jnp.maximum(h3 + x_tile.reshape(TH * W, Cin), 0.0)
    o_ref[0] = out.reshape(TH, W, Cin).astype(o_ref.dtype)


def bottleneck_pallas(x, params, *, tile_h=None, out_dtype=jnp.bfloat16):
    """x: (N, H, W, Cin) float32 NHWC.  params: dict from make_params."""
    N, H, W, Cin = x.shape
    P = params["w1"].shape[1]
    assert Cin == 4 * P, "identity residual path requires inplanes == 4*planes"
    assert W % 8 == 0, "W must be a multiple of 8"
    if tile_h is None:
        tile_h = H if H <= 32 else 16
    if H % tile_h != 0:
        tile_h = H
    TH = tile_h
    HT = H // TH

    bf16 = jnp.bfloat16
    w1 = params["w1"].astype(bf16)
    w2 = params["w2"].astype(bf16)
    w3 = params["w3"].astype(bf16)
    s1, b1 = params["s1"], params["b1"]
    s2, b2 = params["s2"], params["b2"]
    s3, b3 = params["s3"], params["b3"]

    def const(shape):
        return pl.BlockSpec(shape, lambda b, i: (0,) * len(shape))

    flops = 2 * N * H * W * (Cin * P + 9 * P * P + P * Cin)
    bytes_accessed = int(
        x.size * 4                                            # f32 input read
        + N * H * W * Cin * jnp.dtype(out_dtype).itemsize     # output write
        + (w1.size + w2.size + w3.size) * 2
        + (s1.size + b1.size + s2.size + b2.size + s3.size + b3.size) * 4)

    grid_spec = pltpu.PrefetchScalarGridSpec(
        num_scalar_prefetch=0,
        grid=(N, HT),
        in_specs=[
            # main row tile
            pl.BlockSpec((1, TH, W, Cin), lambda b, i: (b, i, 0, 0)),
            # 1-row halo above (clamped; masked in-kernel at the top edge)
            pl.BlockSpec((1, 1, W, Cin),
                         lambda b, i: (b, jnp.maximum(i * TH - 1, 0), 0, 0)),
            # 1-row halo below (clamped; masked in-kernel at the bottom edge)
            pl.BlockSpec((1, 1, W, Cin),
                         lambda b, i: (b, jnp.minimum((i + 1) * TH, H - 1), 0, 0)),
            const((Cin, P)),                       # w1
            const((1, P)), const((1, P)),          # bn1 scale / bias
            const((3, 3, P, P)),                   # w2
            const((1, P)), const((1, P)),          # bn2
            const((P, Cin)),                       # w3
            const((1, Cin)), const((1, Cin)),      # bn3
        ],
        out_specs=pl.BlockSpec((1, TH, W, Cin), lambda b, i: (b, i, 0, 0)),
        scratch_shapes=[pltpu.VMEM((3, TH + 2, W, P), jnp.bfloat16)],
    )

    return pl.pallas_call(
        _bottleneck_kernel,
        out_shape=jax.ShapeDtypeStruct((N, H, W, Cin), out_dtype),
        grid_spec=grid_spec,
        compiler_params=pltpu.CompilerParams(
            dimension_semantics=("parallel", "parallel")),
        cost_estimate=pl.CostEstimate(
            flops=flops, transcendentals=0, bytes_accessed=bytes_accessed),
    )(x, x, x, w1, s1, b1, w2, s2, b2, w3, s3, b3)


def bottleneck_ref(x, p):
    """Pure-JAX reference (NHWC): bf16 matmul inputs, f32 accumulation,
    f32 identity residual (same math as the kernel, before the bf16 store)."""
    bf16 = jnp.bfloat16
    w1 = p["w1"].astype(bf16)
    w2 = p["w2"].astype(bf16)
    w3 = p["w3"].astype(bf16)
    h1 = jnp.einsum("nhwc,cp->nhwp", x.astype(bf16), w1,
                    preferred_element_type=jnp.float32)
    h1 = jnp.maximum(h1 * p["s1"][0] + p["b1"][0], 0.0)
    h2 = lax.conv_general_dilated(
        h1.astype(bf16), w2, window_strides=(1, 1),
        padding=((1, 1), (1, 1)),
        dimension_numbers=("NHWC", "HWIO", "NHWC"),
        preferred_element_type=jnp.float32)
    h2 = jnp.maximum(h2 * p["s2"][0] + p["b2"][0], 0.0)
    h3 = jnp.einsum("nhwp,pc->nhwc", h2.astype(bf16), w3,
                    preferred_element_type=jnp.float32)
    h3 = h3 * p["s3"][0] + p["b3"][0]
    return jnp.maximum(h3 + x, 0.0)


def make_params(key, inplanes, planes):
    eps = 1e-5
    keys = jax.random.split(key, 12)

    def fold_bn(kg, kb, km, kv, c):
        gamma = 1.0 + 0.1 * jax.random.normal(kg, (c,), jnp.float32)
        beta = 0.1 * jax.random.normal(kb, (c,), jnp.float32)
        mean = 0.1 * jax.random.normal(km, (c,), jnp.float32)
        var = jnp.abs(jax.random.normal(kv, (c,), jnp.float32)) + 0.5
        scale = gamma / jnp.sqrt(var + eps)
        bias = beta - mean * scale
        return scale.reshape(1, c), bias.reshape(1, c)

    w1 = 0.2 * jax.random.normal(keys[0], (inplanes, planes), jnp.float32)
    w2 = 0.2 * jax.random.normal(keys[1], (3, 3, planes, planes), jnp.float32)
    w3 = 0.2 * jax.random.normal(keys[2], (planes, planes * 4), jnp.float32)
    s1, b1 = fold_bn(keys[3], keys[4], keys[5], keys[6], planes)
    s2, b2 = fold_bn(keys[7], keys[8], keys[9], keys[10], planes)
    s3, b3 = fold_bn(keys[11], keys[3], keys[7], keys[0], planes * 4)
    return dict(w1=w1, s1=s1, b1=b1, w2=w2, s2=s2, b2=b2,
                w3=w3, s3=s3, b3=b3)


if __name__ == "__main__":
    # planes=32 -> inplanes=128 so the residual channel dim fills a full
    # 128-lane vreg (lane-dense output stores); spatial 16x16, batch 2.
    N, H, W = 2, 16, 16
    planes = 32
    inplanes = planes * 4

    key = jax.random.PRNGKey(0)
    kx, kp = jax.random.split(key)
    x = jax.random.normal(kx, (N, H, W, inplanes), jnp.float32)   # NHWC
    params = make_params(kp, inplanes, planes)

    ref = bottleneck_ref(x, params)

    # Default tiling: whole image per step for H <= 32 (halo rows masked out).
    out_full = jax.block_until_ready(bottleneck_pallas(x, params))
    # Multi-row-tile path: exercises the halo DMAs and the edge masking.
    out_tiled = jax.block_until_ready(bottleneck_pallas(x, params, tile_h=8))

    scale = float(jnp.max(jnp.abs(ref))) + 1e-6
    for out in (out_full, out_tiled):
        assert out.shape == (N, H, W, inplanes)
        assert out.dtype == jnp.bfloat16
        max_err = float(jnp.max(jnp.abs(out.astype(jnp.float32) - ref)))
        assert max_err <= 0.02 * scale + 0.05, (
            f"mismatch vs reference, max abs err = {max_err}, ref max = {scale}")
    print("KERNEL_OK")
</pallas_src>

<mosaic_0001>
module attributes {stable_mosaic.version = 11 : i64} {
  func.func @_bottleneck_kernel(%arg0: i32, %arg1: i32, %arg2: memref<1x16x16x128xf32, #tpu.memory_space<vmem>>, %arg3: memref<1x1x16x128xf32, #tpu.memory_space<vmem>>, %arg4: memref<1x1x16x128xf32, #tpu.memory_space<vmem>>, %arg5: memref<128x32xbf16, #tpu.memory_space<vmem>>, %arg6: memref<1x32xf32, #tpu.memory_space<vmem>>, %arg7: memref<1x32xf32, #tpu.memory_space<vmem>>, %arg8: memref<3x3x32x32xbf16, #tpu.memory_space<vmem>>, %arg9: memref<1x32xf32, #tpu.memory_space<vmem>>, %arg10: memref<1x32xf32, #tpu.memory_space<vmem>>, %arg11: memref<32x128xbf16, #tpu.memory_space<vmem>>, %arg12: memref<1x128xf32, #tpu.memory_space<vmem>>, %arg13: memref<1x128xf32, #tpu.memory_space<vmem>>, %arg14: memref<1x16x16x128xbf16, #tpu.memory_space<vmem>>, %arg15: memref<3x18x16x32xbf16, #tpu.memory_space<vmem>>) attributes {dimension_semantics = [#tpu.dimension_semantics<parallel>, #tpu.dimension_semantics<parallel>], iteration_bounds = array<i64: 2, 1>, scalar_prefetch = 0 : i64, scratch_operands = 1 : i64, tpu.core_type = #tpu.core_type<tc>, window_params = [{transform_indices = @transform_0, window_bounds = array<i64: 1, 16, 16, 128>}, {transform_indices = @transform_1, window_bounds = array<i64: 1, 1, 16, 128>}, {transform_indices = @transform_2, window_bounds = array<i64: 1, 1, 16, 128>}, {pipeline_mode = #tpu.pipeline_mode<synchronous>, transform_indices = @transform_3, window_bounds = array<i64: 128, 32>}, {pipeline_mode = #tpu.pipeline_mode<synchronous>, transform_indices = @transform_4, window_bounds = array<i64: 1, 32>}, {pipeline_mode = #tpu.pipeline_mode<synchronous>, transform_indices = @transform_5, window_bounds = array<i64: 1, 32>}, {pipeline_mode = #tpu.pipeline_mode<synchronous>, transform_indices = @transform_6, window_bounds = array<i64: 3, 3, 32, 32>}, {pipeline_mode = #tpu.pipeline_mode<synchronous>, transform_indices = @transform_7, window_bounds = array<i64: 1, 32>}, {pipeline_mode = #tpu.pipeline_mode<synchronous>, transform_indices = @transform_8, window_bounds = array<i64: 1, 32>}, {pipeline_mode = #tpu.pipeline_mode<synchronous>, transform_indices = @transform_9, window_bounds = array<i64: 32, 128>}, {pipeline_mode = #tpu.pipeline_mode<synchronous>, transform_indices = @transform_10, window_bounds = array<i64: 1, 128>}, {pipeline_mode = #tpu.pipeline_mode<synchronous>, transform_indices = @transform_11, window_bounds = array<i64: 1, 128>}, {transform_indices = @transform_12, window_bounds = array<i64: 1, 16, 16, 128>}]} {
    %c0 = arith.constant 0 : index
    %c0_0 = arith.constant 0 : index
    %0 = vector.load %arg6[%c0, %c0_0] : memref<1x32xf32, #tpu.memory_space<vmem>>, vector<1x32xf32>
    %c0_1 = arith.constant 0 : index
    %c0_2 = arith.constant 0 : index
    %1 = vector.load %arg7[%c0_1, %c0_2] : memref<1x32xf32, #tpu.memory_space<vmem>>, vector<1x32xf32>
    %c0_3 = arith.constant 0 : index
    %c0_4 = arith.constant 0 : index
    %2 = vector.load %arg9[%c0_3, %c0_4] : memref<1x32xf32, #tpu.memory_space<vmem>>, vector<1x32xf32>
    %c0_5 = arith.constant 0 : index
    %c0_6 = arith.constant 0 : index
    %3 = vector.load %arg10[%c0_5, %c0_6] : memref<1x32xf32, #tpu.memory_space<vmem>>, vector<1x32xf32>
    %c0_7 = arith.constant 0 : index
    %c0_8 = arith.constant 0 : index
    %4 = vector.load %arg12[%c0_7, %c0_8] : memref<1x128xf32, #tpu.memory_space<vmem>>, vector<1x128xf32>
    %c0_9 = arith.constant 0 : index
    %c0_10 = arith.constant 0 : index
    %5 = vector.load %arg13[%c0_9, %c0_10] : memref<1x128xf32, #tpu.memory_space<vmem>>, vector<1x128xf32>
    %c0_11 = arith.constant 0 : index
    %c0_12 = arith.constant 0 : index
    %c0_13 = arith.constant 0 : index
    %c0_14 = arith.constant 0 : index
    %6 = vector.load %arg2[%c0_11, %c0_12, %c0_13, %c0_14] : memref<1x16x16x128xf32, #tpu.memory_space<vmem>>, vector<1x16x16x128xf32>
    %7 = vector.shape_cast %6 : vector<1x16x16x128xf32> to vector<16x16x128xf32>
    %c0_15 = arith.constant 0 : index
    %c0_16 = arith.constant 0 : index
    %c0_17 = arith.constant 0 : index
    %c0_18 = arith.constant 0 : index
    %8 = vector.load %arg3[%c0_15, %c0_16, %c0_17, %c0_18] : memref<1x1x16x128xf32, #tpu.memory_space<vmem>>, vector<1x1x16x128xf32>
    %9 = vector.shape_cast %8 : vector<1x1x16x128xf32> to vector<1x16x128xf32>
    %c0_19 = arith.constant 0 : index
    %c0_20 = arith.constant 0 : index
    %c0_21 = arith.constant 0 : index
    %c0_22 = arith.constant 0 : index
    %10 = vector.load %arg4[%c0_19, %c0_20, %c0_21, %c0_22] : memref<1x1x16x128xf32, #tpu.memory_space<vmem>>, vector<1x1x16x128xf32>
    %11 = vector.shape_cast %10 : vector<1x1x16x128xf32> to vector<1x16x128xf32>
    %12 = tpu.concatenate %9, %7, %11 in 0 : vector<1x16x128xf32>, vector<16x16x128xf32>, vector<1x16x128xf32> -> vector<18x16x128xf32>
    %13 = vector.shape_cast %12 : vector<18x16x128xf32> to vector<288x128xf32>
    %14 = arith.truncf %13 : vector<288x128xf32> to vector<288x128xbf16>
    %c0_23 = arith.constant 0 : index
    %c0_24 = arith.constant 0 : index
    %15 = vector.load %arg5[%c0_23, %c0_24] : memref<128x32xbf16, #tpu.memory_space<vmem>>, vector<128x32xbf16>
    %cst = arith.constant dense<0.000000e+00> : vector<288x32xf32>
    %16 = tpu.matmul %14, %15, %cst {dimension_numbers = #tpu.dot_dimension_numbers<[1], [0], [0], [1], [0, 0, 1, 1], [], []>} : vector<288x128xbf16>, vector<128x32xbf16>, vector<288x32xf32> -> vector<288x32xf32>
    %17 = vector.broadcast %0 : vector<1x32xf32> to vector<288x32xf32>
    %18 = arith.mulf %16, %17 : vector<288x32xf32>
    %19 = vector.broadcast %1 : vector<1x32xf32> to vector<288x32xf32>
    %20 = arith.addf %18, %19 : vector<288x32xf32>
    %cst_25 = arith.constant 0.000000e+00 : f32
    %21 = vector.broadcast %cst_25 : f32 to vector<288x32xf32>
    %22 = arith.maximumf %20, %21 : vector<288x32xf32>
    %23 = vector.shape_cast %22 : vector<288x32xf32> to vector<18x16x32xf32>
    %24 = tpu.iota {dimensions = array<i32: 0>} : vector<18x1x1xi32>
    %c0_i32 = arith.constant 0 : i32
    %25 = vector.broadcast %c0_i32 : i32 to vector<18x1x1xi32>
    %26 = arith.cmpi sgt, %24, %25 : vector<18x1x1xi32>
    %c0_i32_26 = arith.constant 0 : i32
    %27 = arith.cmpi sgt, %arg1, %c0_i32_26 : i32
    %28 = vector.broadcast %27 : i1 to vector<18x1x1xi1>
    %29 = arith.ori %26, %28 : vector<18x1x1xi1>
    %c17_i32 = arith.constant 17 : i32
    %30 = vector.broadcast %c17_i32 : i32 to vector<18x1x1xi32>
    %31 = arith.cmpi slt, %24, %30 : vector<18x1x1xi32>
    %c0_i32_27 = arith.constant 0 : i32
    %32 = arith.cmpi slt, %arg1, %c0_i32_27 : i32
    %33 = vector.broadcast %32 : i1 to vector<18x1x1xi1>
    %34 = arith.ori %31, %33 : vector<18x1x1xi1>
    %35 = arith.andi %29, %34 : vector<18x1x1xi1>
    %cst_28 = arith.constant 0.000000e+00 : f32
    %36 = vector.shape_cast %35 : vector<18x1x1xi1> to vector<18x1x1xi1>
    %37 = vector.broadcast %36 : vector<18x1x1xi1> to vector<18x16x32xi1>
    %38 = vector.broadcast %cst_28 : f32 to vector<18x16x32xf32>
    %39 = arith.select %37, %23, %38 : vector<18x16x32xi1>, vector<18x16x32xf32>
    %40 = arith.truncf %39 : vector<18x16x32xf32> to vector<18x16x32xbf16>
    %cst_29 = arith.constant 0.000000e+00 : bf16
    %41 = vector.broadcast %cst_29 : bf16 to vector<18x1x32xbf16>
    %42 = vector.extract_strided_slice %40 {offsets = [0, 0, 0], sizes = [18, 15, 32], strides = [1, 1, 1]} : vector<18x16x32xbf16> to vector<18x15x32xbf16>
    %43 = tpu.concatenate %41, %42 in 1 : vector<18x1x32xbf16>, vector<18x15x32xbf16> -> vector<18x16x32xbf16>
    %c0_30 = arith.constant 0 : index
    %c0_31 = arith.constant 0 : index
    %c0_32 = arith.constant 0 : index
    %c0_33 = arith.constant 0 : index
    %44 = vector.load %arg15[%c0_30, %c0_31, %c0_32, %c0_33] : memref<3x18x16x32xbf16, #tpu.memory_space<vmem>>, vector<1x18x16x32xbf16>
    %45 = vector.shape_cast %44 : vector<1x18x16x32xbf16> to vector<18x16x32xbf16>
    %46 = vector.shape_cast %43 : vector<18x16x32xbf16> to vector<1x18x16x32xbf16>
    tpu.vector_store %arg15[%c0_30, %c0_31, %c0_32, %c0_33], %46 {strides = array<i32>} : memref<3x18x16x32xbf16, #tpu.memory_space<vmem>>, vector<1x18x16x32xbf16>,
    %c1 = arith.constant 1 : index
    %c0_34 = arith.constant 0 : index
    %c0_35 = arith.constant 0 : index
    %c0_36 = arith.constant 0 : index
    %47 = vector.load %arg15[%c1, %c0_34, %c0_35, %c0_36] : memref<3x18x16x32xbf16, #tpu.memory_space<vmem>>, vector<1x18x16x32xbf16>
    %48 = vector.shape_cast %47 : vector<1x18x16x32xbf16> to vector<18x16x32xbf16>
    %49 = vector.shape_cast %40 : vector<18x16x32xbf16> to vector<1x18x16x32xbf16>
    tpu.vector_store %arg15[%c1, %c0_34, %c0_35, %c0_36], %49 {strides = array<i32>} : memref<3x18x16x32xbf16, #tpu.memory_space<vmem>>, vector<1x18x16x32xbf16>,
    %50 = vector.extract_strided_slice %40 {offsets = [0, 1, 0], sizes = [18, 15, 32], strides = [1, 1, 1]} : vector<18x16x32xbf16> to vector<18x15x32xbf16>
    %51 = tpu.concatenate %50, %41 in 1 : vector<18x15x32xbf16>, vector<18x1x32xbf16> -> vector<18x16x32xbf16>
    %c2 = arith.constant 2 : index
    %c0_37 = arith.constant 0 : index
    %c0_38 = arith.constant 0 : index
    %c0_39 = arith.constant 0 : index
    %52 = vector.load %arg15[%c2, %c0_37, %c0_38, %c0_39] : memref<3x18x16x32xbf16, #tpu.memory_space<vmem>>, vector<1x18x16x32xbf16>
    %53 = vector.shape_cast %52 : vector<1x18x16x32xbf16> to vector<18x16x32xbf16>
    %54 = vector.shape_cast %51 : vector<18x16x32xbf16> to vector<1x18x16x32xbf16>
    tpu.vector_store %arg15[%c2, %c0_37, %c0_38, %c0_39], %54 {strides = array<i32>} : memref<3x18x16x32xbf16, #tpu.memory_space<vmem>>, vector<1x18x16x32xbf16>,
    %c0_40 = arith.constant 0 : index
    %c0_41 = arith.constant 0 : index
    %c0_42 = arith.constant 0 : index
    %c0_43 = arith.constant 0 : index
    %55 = vector.load %arg15[%c0_40, %c0_41, %c0_42, %c0_43] : memref<3x18x16x32xbf16, #tpu.memory_space<vmem>>, vector<1x16x16x32xbf16>
    %56 = vector.shape_cast %55 : vector<1x16x16x32xbf16> to vector<16x16x32xbf16>
    %57 = vector.shape_cast %56 : vector<16x16x32xbf16> to vector<256x32xbf16>
    %c0_44 = arith.constant 0 : index
    %c0_45 = arith.constant 0 : index
    %c0_46 = arith.constant 0 : index
    %c0_47 = arith.constant 0 : index
    %58 = vector.load %arg8[%c0_44, %c0_45, %c0_46, %c0_47] : memref<3x3x32x32xbf16, #tpu.memory_space<vmem>>, vector<1x1x32x32xbf16>
    %59 = vector.shape_cast %58 : vector<1x1x32x32xbf16> to vector<32x32xbf16>
    %cst_48 = arith.constant dense<0.000000e+00> : vector<256x32xf32>
    %60 = tpu.matmul %57, %59, %cst_48 {dimension_numbers = #tpu.dot_dimension_numbers<[1], [0], [0], [1], [0, 0, 1, 1], [], []>} : vector<256x32xbf16>, vector<32x32xbf16>, vector<256x32xf32> -> vector<256x32xf32>
    %c1_49 = arith.constant 1 : index
    %c0_50 = arith.constant 0 : index
    %c0_51 = arith.constant 0 : index
    %c0_52 = arith.constant 0 : index
    %61 = vector.load %arg15[%c1_49, %c0_50, %c0_51, %c0_52] : memref<3x18x16x32xbf16, #tpu.memory_space<vmem>>, vector<1x16x16x32xbf16>
    %62 = vector.shape_cast %61 : vector<1x16x16x32xbf16> to vector<16x16x32xbf16>
    %63 = vector.shape_cast %62 : vector<16x16x32xbf16> to vector<256x32xbf16>
    %c0_53 = arith.constant 0 : index
    %c1_54 = arith.constant 1 : index
    %c0_55 = arith.constant 0 : index
    %c0_56 = arith.constant 0 : index
    %64 = vector.load %arg8[%c0_53, %c1_54, %c0_55, %c0_56] : memref<3x3x32x32xbf16, #tpu.memory_space<vmem>>, vector<1x1x32x32xbf16>
    %65 = vector.shape_cast %64 : vector<1x1x32x32xbf16> to vector<32x32xbf16>
    %cst_57 = arith.constant dense<0.000000e+00> : vector<256x32xf32>
    %66 = tpu.matmul %63, %65, %cst_57 {dimension_numbers = #tpu.dot_dimension_numbers<[1], [0], [0], [1], [0, 0, 1, 1], [], []>} : vector<256x32xbf16>, vector<32x32xbf16>, vector<256x32xf32> -> vector<256x32xf32>
    %67 = arith.addf %60, %66 : vector<256x32xf32>
    %c2_58 = arith.constant 2 : index
    %c0_59 = arith.constant 0 : index
    %c0_60 = arith.constant 0 : index
    %c0_61 = arith.constant 0 : index
    %68 = vector.load %arg15[%c2_58, %c0_59, %c0_60, %c0_61] : memref<3x18x16x32xbf16, #tpu.memory_space<vmem>>, vector<1x16x16x32xbf16>
    %69 = vector.shape_cast %68 : vector<1x16x16x32xbf16> to vector<16x16x32xbf16>
    %70 = vector.shape_cast %69 : vector<16x16x32xbf16> to vector<256x32xbf16>
    %c0_62 = arith.constant 0 : index
    %c2_63 = arith.constant 2 : index
    %c0_64 = arith.constant 0 : index
    %c0_65 = arith.constant 0 : index
    %71 = vector.load %arg8[%c0_62, %c2_63, %c0_64, %c0_65] : memref<3x3x32x32xbf16, #tpu.memory_space<vmem>>, vector<1x1x32x32xbf16>
    %72 = vector.shape_cast %71 : vector<1x1x32x32xbf16> to vector<32x32xbf16>
    %cst_66 = arith.constant dense<0.000000e+00> : vector<256x32xf32>
    %73 = tpu.matmul %70, %72, %cst_66 {dimension_numbers = #tpu.dot_dimension_numbers<[1], [0], [0], [1], [0, 0, 1, 1], [], []>} : vector<256x32xbf16>, vector<32x32xbf16>, vector<256x32xf32> -> vector<256x32xf32>
    %74 = arith.addf %67, %73 : vector<256x32xf32>
    %c0_67 = arith.constant 0 : index
    %c1_68 = arith.constant 1 : index
    %c0_69 = arith.constant 0 : index
    %c0_70 = arith.constant 0 : index
    %75 = vector.load %arg15[%c0_67, %c1_68, %c0_69, %c0_70] : memref<3x18x16x32xbf16, #tpu.memory_space<vmem>>, vector<1x16x16x32xbf16>
    %76 = vector.shape_cast %75 : vector<1x16x16x32xbf16> to vector<16x16x32xbf16>
    %77 = vector.shape_cast %76 : vector<16x16x32xbf16> to vector<256x32xbf16>
    %c1_71 = arith.constant 1 : index
    %c0_72 = arith.constant 0 : index
    %c0_73 = arith.constant 0 : index
    %c0_74 = arith.constant 0 : index
    %78 = vector.load %arg8[%c1_71, %c0_72, %c0_73, %c0_74] : memref<3x3x32x32xbf16, #tpu.memory_space<vmem>>, vector<1x1x32x32xbf16>
    %79 = vector.shape_cast %78 : vector<1x1x32x32xbf16> to vector<32x32xbf16>
    %cst_75 = arith.constant dense<0.000000e+00> : vector<256x32xf32>
    %80 = tpu.matmul %77, %79, %cst_75 {dimension_numbers = #tpu.dot_dimension_numbers<[1], [0], [0], [1], [0, 0, 1, 1], [], []>} : vector<256x32xbf16>, vector<32x32xbf16>, vector<256x32xf32> -> vector<256x32xf32>
    %81 = arith.addf %74, %80 : vector<256x32xf32>
    %c1_76 = arith.constant 1 : index
    %c1_77 = arith.constant 1 : index
    %c0_78 = arith.constant 0 : index
    %c0_79 = arith.constant 0 : index
    %82 = vector.load %arg15[%c1_76, %c1_77, %c0_78, %c0_79] : memref<3x18x16x32xbf16, #tpu.memory_space<vmem>>, vector<1x16x16x32xbf16>
    %83 = vector.shape_cast %82 : vector<1x16x16x32xbf16> to vector<16x16x32xbf16>
    %84 = vector.shape_cast %83 : vector<16x16x32xbf16> to vector<256x32xbf16>
    %c1_80 = arith.constant 1 : index
    %c1_81 = arith.constant 1 : index
    %c0_82 = arith.constant 0 : index
    %c0_83 = arith.constant 0 : index
    %85 = vector.load %arg8[%c1_80, %c1_81, %c0_82, %c0_83] : memref<3x3x32x32xbf16, #tpu.memory_space<vmem>>, vector<1x1x32x32xbf16>
    %86 = vector.shape_cast %85 : vector<1x1x32x32xbf16> to vector<32x32xbf16>
    %cst_84 = arith.constant dense<0.000000e+00> : vector<256x32xf32>
    %87 = tpu.matmul %84, %86, %cst_84 {dimension_numbers = #tpu.dot_dimension_numbers<[1], [0], [0], [1], [0, 0, 1, 1], [], []>} : vector<256x32xbf16>, vector<32x32xbf16>, vector<256x32xf32> -> vector<256x32xf32>
    %88 = arith.addf %81, %87 : vector<256x32xf32>
    %c2_85 = arith.constant 2 : index
    %c1_86 = arith.constant 1 : index
    %c0_87 = arith.constant 0 : index
    %c0_88 = arith.constant 0 : index
    %89 = vector.load %arg15[%c2_85, %c1_86, %c0_87, %c0_88] : memref<3x18x16x32xbf16, #tpu.memory_space<vmem>>, vector<1x16x16x32xbf16>
    %90 = vector.shape_cast %89 : vector<1x16x16x32xbf16> to vector<16x16x32xbf16>
    %91 = vector.shape_cast %90 : vector<16x16x32xbf16> to vector<256x32xbf16>
    %c1_89 = arith.constant 1 : index
    %c2_90 = arith.constant 2 : index
    %c0_91 = arith.constant 0 : index
    %c0_92 = arith.constant 0 : index
    %92 = vector.load %arg8[%c1_89, %c2_90, %c0_91, %c0_92] : memref<3x3x32x32xbf16, #tpu.memory_space<vmem>>, vector<1x1x32x32xbf16>
    %93 = vector.shape_cast %92 : vector<1x1x32x32xbf16> to vector<32x32xbf16>
    %cst_93 = arith.constant dense<0.000000e+00> : vector<256x32xf32>
    %94 = tpu.matmul %91, %93, %cst_93 {dimension_numbers = #tpu.dot_dimension_numbers<[1], [0], [0], [1], [0, 0, 1, 1], [], []>} : vector<256x32xbf16>, vector<32x32xbf16>, vector<256x32xf32> -> vector<256x32xf32>
    %95 = arith.addf %88, %94 : vector<256x32xf32>
    %c0_94 = arith.constant 0 : index
    %c2_95 = arith.constant 2 : index
    %c0_96 = arith.constant 0 : index
    %c0_97 = arith.constant 0 : index
    %96 = vector.load %arg15[%c0_94, %c2_95, %c0_96, %c0_97] : memref<3x18x16x32xbf16, #tpu.memory_space<vmem>>, vector<1x16x16x32xbf16>
    %97 = vector.shape_cast %96 : vector<1x16x16x32xbf16> to vector<16x16x32xbf16>
    %98 = vector.shape_cast %97 : vector<16x16x32xbf16> to vector<256x32xbf16>
    %c2_98 = arith.constant 2 : index
    %c0_99 = arith.constant 0 : index
    %c0_100 = arith.constant 0 : index
    %c0_101 = arith.constant 0 : index
    %99 = vector.load %arg8[%c2_98, %c0_99, %c0_100, %c0_101] : memref<3x3x32x32xbf16, #tpu.memory_space<vmem>>, vector<1x1x32x32xbf16>
    %100 = vector.shape_cast %99 : vector<1x1x32x32xbf16> to vector<32x32xbf16>
    %cst_102 = arith.constant dense<0.000000e+00> : vector<256x32xf32>
    %101 = tpu.matmul %98, %100, %cst_102 {dimension_numbers = #tpu.dot_dimension_numbers<[1], [0], [0], [1], [0, 0, 1, 1], [], []>} : vector<256x32xbf16>, vector<32x32xbf16>, vector<256x32xf32> -> vector<256x32xf32>
    %102 = arith.addf %95, %101 : vector<256x32xf32>
    %c1_103 = arith.constant 1 : index
    %c2_104 = arith.constant 2 : index
    %c0_105 = arith.constant 0 : index
    %c0_106 = arith.constant 0 : index
    %103 = vector.load %arg15[%c1_103, %c2_104, %c0_105, %c0_106] : memref<3x18x16x32xbf16, #tpu.memory_space<vmem>>, vector<1x16x16x32xbf16>
    %104 = vector.shape_cast %103 : vector<1x16x16x32xbf16> to vector<16x16x32xbf16>
    %105 = vector.shape_cast %104 : vector<16x16x32xbf16> to vector<256x32xbf16>
    %c2_107 = arith.constant 2 : index
    %c1_108 = arith.constant 1 : index
    %c0_109 = arith.constant 0 : index
    %c0_110 = arith.constant 0 : index
    %106 = vector.load %arg8[%c2_107, %c1_108, %c0_109, %c0_110] : memref<3x3x32x32xbf16, #tpu.memory_space<vmem>>, vector<1x1x32x32xbf16>
    %107 = vector.shape_cast %106 : vector<1x1x32x32xbf16> to vector<32x32xbf16>
    %cst_111 = arith.constant dense<0.000000e+00> : vector<256x32xf32>
    %108 = tpu.matmul %105, %107, %cst_111 {dimension_numbers = #tpu.dot_dimension_numbers<[1], [0], [0], [1], [0, 0, 1, 1], [], []>} : vector<256x32xbf16>, vector<32x32xbf16>, vector<256x32xf32> -> vector<256x32xf32>
    %109 = arith.addf %102, %108 : vector<256x32xf32>
    %c2_112 = arith.constant 2 : index
    %c2_113 = arith.constant 2 : index
    %c0_114 = arith.constant 0 : index
    %c0_115 = arith.constant 0 : index
    %110 = vector.load %arg15[%c2_112, %c2_113, %c0_114, %c0_115] : memref<3x18x16x32xbf16, #tpu.memory_space<vmem>>, vector<1x16x16x32xbf16>
    %111 = vector.shape_cast %110 : vector<1x16x16x32xbf16> to vector<16x16x32xbf16>
    %112 = vector.shape_cast %111 : vector<16x16x32xbf16> to vector<256x32xbf16>
    %c2_116 = arith.constant 2 : index
    %c2_117 = arith.constant 2 : index
    %c0_118 = arith.constant 0 : index
    %c0_119 = arith.constant 0 : index
    %113 = vector.load %arg8[%c2_116, %c2_117, %c0_118, %c0_119] : memref<3x3x32x32xbf16, #tpu.memory_space<vmem>>, vector<1x1x32x32xbf16>
    %114 = vector.shape_cast %113 : vector<1x1x32x32xbf16> to vector<32x32xbf16>
    %cst_120 = arith.constant dense<0.000000e+00> : vector<256x32xf32>
    %115 = tpu.matmul %112, %114, %cst_120 {dimension_numbers = #tpu.dot_dimension_numbers<[1], [0], [0], [1], [0, 0, 1, 1], [], []>} : vector<256x32xbf16>, vector<32x32xbf16>, vector<256x32xf32> -> vector<256x32xf32>
    %116 = arith.addf %109, %115 : vector<256x32xf32>
    %117 = vector.broadcast %2 : vector<1x32xf32> to vector<256x32xf32>
    %118 = arith.mulf %116, %117 : vector<256x32xf32>
    %119 = vector.broadcast %3 : vector<1x32xf32> to vector<256x32xf32>
    %120 = arith.addf %118, %119 : vector<256x32xf32>
    %cst_121 = arith.constant 0.000000e+00 : f32
    %121 = vector.broadcast %cst_121 : f32 to vector<256x32xf32>
    %122 = arith.maximumf %120, %121 : vector<256x32xf32>
    %123 = arith.truncf %122 : vector<256x32xf32> to vector<256x32xbf16>
    %c0_122 = arith.constant 0 : index
    %c0_123 = arith.constant 0 : index
    %124 = vector.load %arg11[%c0_122, %c0_123] : memref<32x128xbf16, #tpu.memory_space<vmem>>, vector<32x128xbf16>
    %cst_124 = arith.constant dense<0.000000e+00> : vector<256x128xf32>
    %125 = tpu.matmul %123, %124, %cst_124 {dimension_numbers = #tpu.dot_dimension_numbers<[1], [0], [0], [1], [0, 0, 1, 1], [], []>} : vector<256x32xbf16>, vector<32x128xbf16>, vector<256x128xf32> -> vector<256x128xf32>
    %126 = vector.broadcast %4 : vector<1x128xf32> to vector<256x128xf32>
    %127 = arith.mulf %125, %126 : vector<256x128xf32>
    %128 = vector.broadcast %5 : vector<1x128xf32> to vector<256x128xf32>
    %129 = arith.addf %127, %128 : vector<256x128xf32>
    %130 = vector.shape_cast %7 : vector<16x16x128xf32> to vector<256x128xf32>
    %131 = arith.addf %129, %130 : vector<256x128xf32>
    %cst_125 = arith.constant 0.000000e+00 : f32
    %132 = vector.broadcast %cst_125 : f32 to vector<256x128xf32>
    %133 = arith.maximumf %131, %132 : vector<256x128xf32>
    %134 = vector.shape_cast %133 : vector<256x128xf32> to vector<16x16x128xf32>
    %135 = arith.truncf %134 : vector<16x16x128xf32> to vector<16x16x128xbf16>
    %c0_126 = arith.constant 0 : index
    %c0_127 = arith.constant 0 : index
    %c0_128 = arith.constant 0 : index
    %c0_129 = arith.constant 0 : index
    %136 = vector.load %arg14[%c0_126, %c0_127, %c0_128, %c0_129] : memref<1x16x16x128xbf16, #tpu.memory_space<vmem>>, vector<1x16x16x128xbf16>
    %137 = vector.shape_cast %136 : vector<1x16x16x128xbf16> to vector<16x16x128xbf16>
    %138 = vector.shape_cast %135 : vector<16x16x128xbf16> to vector<1x16x16x128xbf16>
    tpu.vector_store %arg14[%c0_126, %c0_127, %c0_128, %c0_129], %138 {strides = array<i32>} : memref<1x16x16x128xbf16, #tpu.memory_space<vmem>>, vector<1x16x16x128xbf16>,
    return
  }
  func.func @transform_0(%arg0: i32, %arg1: i32) -> (i32, i32, i32, i32) {
    %c0_i32 = arith.constant 0 : i32
    %c0_i32_0 = arith.constant 0 : i32
    %c0_i32_1 = arith.constant 0 : i32
    return %arg0, %arg1, %c0_i32, %c0_i32_0 : i32, i32, i32, i32
  }
  func.func @transform_1(%arg0: i32, %arg1: i32) -> (i32, i32, i32, i32) {
    %c16_i32 = arith.constant 16 : i32
    %0 = arith.muli %arg1, %c16_i32 : i32
    %c1_i32 = arith.constant 1 : i32
    %1 = arith.subi %0, %c1_i32 : i32
    %c0_i32 = arith.constant 0 : i32
    %2 = arith.maxsi %1, %c0_i32 : i32
    %c0_i32_0 = arith.constant 0 : i32
    %c0_i32_1 = arith.constant 0 : i32
    %c0_i32_2 = arith.constant 0 : i32
    return %arg0, %2, %c0_i32_0, %c0_i32_1 : i32, i32, i32, i32
  }
  func.func @transform_2(%arg0: i32, %arg1: i32) -> (i32, i32, i32, i32) {
    %c1_i32 = arith.constant 1 : i32
    %0 = arith.addi %arg1, %c1_i32 : i32
    %c16_i32 = arith.constant 16 : i32
    %1 = arith.muli %0, %c16_i32 : i32
    %c15_i32 = arith.constant 15 : i32
    %2 = arith.minsi %1, %c15_i32 : i32
    %c0_i32 = arith.constant 0 : i32
    %c0_i32_0 = arith.constant 0 : i32
    %c0_i32_1 = arith.constant 0 : i32
    return %arg0, %2, %c0_i32, %c0_i32_0 : i32, i32, i32, i32
  }
  func.func @transform_3(%arg0: i32, %arg1: i32) -> (i32, i32) {
    %c0_i32 = arith.constant 0 : i32
    %c0_i32_0 = arith.constant 0 : i32
    %c0_i32_1 = arith.constant 0 : i32
    return %c0_i32, %c0_i32_0 : i32, i32
  }
  func.func @transform_4(%arg0: i32, %arg1: i32) -> (i32, i32) {
    %c0_i32 = arith.constant 0 : i32
    %c0_i32_0 = arith.constant 0 : i32
    %c0_i32_1 = arith.constant 0 : i32
    return %c0_i32, %c0_i32_0 : i32, i32
  }
  func.func @transform_5(%arg0: i32, %arg1: i32) -> (i32, i32) {
    %c0_i32 = arith.constant 0 : i32
    %c0_i32_0 = arith.constant 0 : i32
    %c0_i32_1 = arith.constant 0 : i32
    return %c0_i32, %c0_i32_0 : i32, i32
  }
  func.func @transform_6(%arg0: i32, %arg1: i32) -> (i32, i32, i32, i32) {
    %c0_i32 = arith.constant 0 : i32
    %c0_i32_0 = arith.constant 0 : i32
    %c0_i32_1 = arith.constant 0 : i32
    %c0_i32_2 = arith.constant 0 : i32
    %c0_i32_3 = arith.constant 0 : i32
    return %c0_i32, %c0_i32_0, %c0_i32_1, %c0_i32_2 : i32, i32, i32, i32
  }
  func.func @transform_7(%arg0: i32, %arg1: i32) -> (i32, i32) {
    %c0_i32 = arith.constant 0 : i32
    %c0_i32_0 = arith.constant 0 : i32
    %c0_i32_1 = arith.constant 0 : i32
    return %c0_i32, %c0_i32_0 : i32, i32
  }
  func.func @transform_8(%arg0: i32, %arg1: i32) -> (i32, i32) {
    %c0_i32 = arith.constant 0 : i32
    %c0_i32_0 = arith.constant 0 : i32
    %c0_i32_1 = arith.constant 0 : i32
    return %c0_i32, %c0_i32_0 : i32, i32
  }
  func.func @transform_9(%arg0: i32, %arg1: i32) -> (i32, i32) {
    %c0_i32 = arith.constant 0 : i32
    %c0_i32_0 = arith.constant 0 : i32
    %c0_i32_1 = arith.constant 0 : i32
    return %c0_i32, %c0_i32_0 : i32, i32
  }
  func.func @transform_10(%arg0: i32, %arg1: i32) -> (i32, i32) {
    %c0_i32 = arith.constant 0 : i32
    %c0_i32_0 = arith.constant 0 : i32
    %c0_i32_1 = arith.constant 0 : i32
    return %c0_i32, %c0_i32_0 : i32, i32
  }
  func.func @transform_11(%arg0: i32, %arg1: i32) -> (i32, i32) {
    %c0_i32 = arith.constant 0 : i32
    %c0_i32_0 = arith.constant 0 : i32
    %c0_i32_1 = arith.constant 0 : i32
    return %c0_i32, %c0_i32_0 : i32, i32
  }
  func.func @transform_12(%arg0: i32, %arg1: i32) -> (i32, i32, i32, i32) {
    %c0_i32 = arith.constant 0 : i32
    %c0_i32_0 = arith.constant 0 : i32
    %c0_i32_1 = arith.constant 0 : i32
    return %arg0, %arg1, %c0_i32, %c0_i32_0 : i32, i32, i32, i32
  }
}

</mosaic_0001>

<bundles_post_ra>
// kernel: tpu_custom_call.1
= control target key start
LH: loop header
LB: loop body
LE: loop exit
PB: predicated region body
PF: predicated region fallthrough
CT: control target
= control target key end

     0   :  { %s7565_s0 = inlined_call_operand.hbm [shape: f32[2,16,16,128], index: 0, kind: input, shape index: {}]   ;;  %s7566_s1 = inlined_call_operand.hbm [shape: f32[2,16,16,128], index: 1, kind: input, shape index: {}]   ;;  %s7567_s2 = inlined_call_operand.hbm [shape: f32[2,16,16,128], index: 2, kind: input, shape index: {}]   ;;  %s7568_s3 = inlined_call_operand.vmem [shape: bf16[128,32], index: 3, kind: input, shape index: {}]   ;;  %s7569_s4 = inlined_call_operand.vmem [shape: f32[1,32], index: 4, kind: input, shape index: {}]   ;;  %s7570_s5 = inlined_call_operand.vmem [shape: f32[1,32], index: 5, kind: input, shape index: {}]   ;;  %s7571_s6 = inlined_call_operand.hbm [shape: bf16[3,3,32,32], index: 6, kind: input, shape index: {}]   ;;  %s7572_s7 = inlined_call_operand.vmem [shape: f32[1,32], index: 7, kind: input, shape index: {}]   ;;  %s7573_s8 = inlined_call_operand.vmem [shape: f32[1,32], index: 8, kind: input, shape index: {}]   ;;  %s7574_s9 = inlined_call_operand.vmem [shape: bf16[32,128], index: 9, kind: input, shape index: {}]   ;;  %s7575_s10 = inlined_call_operand.vmem [shape: f32[1,128], index: 10, kind: input, shape index: {}]   ;;  %s7576_s11 = inlined_call_operand.vmem [shape: f32[1,128], index: 11, kind: input, shape index: {}]   ;;  %s7577_s12 = inlined_call_operand.hbm [shape: bf16[2,16,16,128], index: 12, kind: output, shape index: {}]  }
   0x1   :  { %7603 = sst [smem:[#allocation25_spill]] %s7566_s1 }
   0x2   :  { %7604 = sst [smem:[#allocation26_spill]] %s7572_s7 }
   0x3   :  { %7605 = sst [smem:[#allocation27_spill]] %s7573_s8 }
   0x4   :  { %7606 = sst [smem:[#allocation28_spill]] %s7574_s9 }
   0x5   :  { %7607 = sst [smem:[#allocation29_spill]] %s7575_s10 }
   0x6   :  { %7608 = sst [smem:[#allocation30_spill]] %s7576_s11 }
   0x7   :  { %7609 = sst [smem:[#allocation31_spill]] %s7577_s12 }
   0x8   :  { %17 = vsyncpa [#allocation4], 0 }
   0x9   :  { %19 = vsyncpa [#allocation4 + $0x1], 0 }
   0xa   :  { %20 = vsyncpa [#allocation7], 0 }
   0xb   :  { %22 = vsyncpa [#allocation7 + $0x1], 0 }
   0xc   :  { %23 = vsyncpa [#allocation10], 0 }
   0xd   :  { %24 = vsyncpa [#allocation5], 0 }
   0xe   :  { %26 = vsyncpa [#allocation5 + $0x1], 0  ;;  %s6290_s21 = smov 0   ;;  %s6292_s22 = smov 0  }
   0xf   :  { %s6294_s23 = smov 0   ;;  %s6296_s24 = smov 0  }
  0x10   :  { %s6298_s25 = smov 0   ;;  %s6300_s26 = smov 0  }
  0x11 LB: > { %7610 = sst [smem:[#allocation16_spill]] %s6190_s21  ;;  %s44_s27 = sadd.s32 1, %s6206_s25  ;;  %s6210_s26 = sphi %s6300_s26, %s32_s26   ;;  %s6206_s25 = sphi %s6298_s25, %s7659_s25   ;;  %s6202_s24 = sphi %s6296_s24, %s7658_s24   ;;  %s6198_s23 = sphi %s6294_s23, %s7657_s23   ;;  %s6194_s22 = sphi %s6292_s22, %s7661_s22   ;;  %s6190_s21 = sphi %s6290_s21, %s7660_s21  }
  0x12   : > { %7611 = sst [smem:[#allocation17_spill]] %s6198_s23  ;;  %s53_s28 = sadd.s32 1, %s6198_s23 }
  0x13   : > { %7612 = sst [smem:[#allocation18_spill]] %s6202_s24  ;;  %p46_p0 = scmp.ge.s32.totalorder %s44_s27, 2 }
  0x14   : > { %7613 = sst [smem:[#allocation19_spill]] %s6206_s25  ;;  %p7582_p1 = scmp.ne.s32.totalorder %s6198_s23, %s6194_s22 }
  0x15   : > { %7614 = sst [smem:[#allocation20_spill]] %s6210_s26  ;;  %p61_p2 = scmp.eq.s32.totalorder %s6210_s26, 0 }
  0x16   : > { %s7663_s27 = smov (%p46_p0, %s44_s27), 0  ;;  %p5882_p5 = scmp.lt.s32.totalorder %s6210_s26, 2 }
  0x17   : > { %7615 = sst [smem:[#allocation21_spill]] %s7663_s27  ;;  %p62_p4 = por %p61_p2, %p7582_p1 }
  0x18   : > { %s48_s29 = ssub.s32 %s6206_s25, %s7663_s27  ;;  %s6335_s30 = sand.u32 1, %s6198_s23  }
  0x19   : > { %p51_p6 = scmp.eq.s32.totalorder %s48_s29, 0  ;;  %s6338_s13 = sshll.u32 %s6206_s25, 12 }
  0x1a   : > { %p6340_p7 = pnand %p5882_p5, %p62_p4  ;;  %s440_s16 = sand.u32 1, %s6210_s26  }
  0x1b   : > { %s6345_s15 = scalar_select %p51_p6, %s6198_s23, %s53_s28  }
  0x1c   : > { %s7616_s14 = scalar_select %p6340_p7, 1, 0 }
  0x1d   : > { %7617 = sst [smem:[#allocation22_spill]] %s6345_s15  ;;  %s7580_s17 = sshll.u32 %s6335_s30, 4 }
  0x1e   : > { %s7618_s1 = sld [smem:[#allocation25_spill]]  ;;  %s444_s29 = scalar_lea.vmem [#allocation6], %s7580_s17 }
  0x1f   : > { %s457_s27 = sshll.u32 %s444_s29, 4  ;;  %s6359_s25 = scalar_lea.sflag [#allocation7], %s440_s16  ;;  %s6357_s27 = int_to_ptr.vmem [resolvable:$true] %s457_s27 }
  0x20   : > { %p6365_p9 = pneg %p6340_p7 }
  0x22   : > { %s7619_s15 = scalar_select %p6365_p9, 1, 0 }
  0x24   : > { %s6353_s20 = scalar_lea.hbm %s7618_s1, %s6338_s13  ;;  %s6007_s17 = scalar_lea.hbm %s7618_s1, 8192 }
  0x25   : > { %s6002_s28 = scalar_lea.hbm %s6353_s20, 256  ;;  %p6008_p12 = scmp.lt.u32.totalorder %s6353_s20, %s7618_s1 }
  0x26   : > { %p6003_p8 = scmp.ne.s32.totalorder %s6353_s20, %s6002_s28  ;;  %p6009_p13 = scmp.lt.u32.totalorder %s6007_s17, %s6002_s28 }
  0x27   : > { %p6011_p2 = scmp.lt.u32.totalorder %s6002_s28, %s6353_s20 }
  0x28   : > { %p6005_p10 = pnand %p6365_p9, %p6003_p8  ;;  %p6010_p0 = por %p6009_p13, %p6008_p12 }
  0x2a   : > { %p6006_p11 = pneg %p6005_p10  ;;  %p6012_p4 = por %p6011_p2, %p6010_p0 }
  0x2c   : > { %p6013_p5 = pnand %p6012_p4, %p6006_p11 }
  0x2e   : > { %6016 = shalt.err (!%p6013_p5)
}
  0x2f   : > { %s6017_s16 = scalar_lea.vmem %s6357_s27, 256  ;;  %s6212_s18 = smov [#allocation6]  }
  0x30   : > { %p6018_p6 = scmp.ne.s32.totalorder %s6357_s27, %s6017_s16  ;;  %s6022_s19 = sshll.u32 %s6212_s18, 4  ;;  %s6023_s19 = int_to_ptr.vmem [resolvable:$false] %s6022_s19 }
  0x31   : > { %s6024_s12 = scalar_lea.vmem %s6023_s19, 512  ;;  %p6025_p3 = scmp.lt.s32.totalorder %s6357_s27, %s6023_s19 }
  0x32   : > { %p6020_p8 = pnand %p6018_p6, %p6365_p9  ;;  %p6026_p1 = scmp.lt.s32.totalorder %s6024_s12, %s6017_s16 }
  0x34   : > { %p6021_p10 = pneg %p6020_p8  ;;  %p6027_p12 = por %p6026_p1, %p6025_p3 }
  0x36   : > { %p6028_p13 = pnand %p6027_p12, %p6021_p10 }
  0x38   : > { %6031 = shalt.err (!%p6028_p13)
}
  0x39   : > { %s7583_s17 = smov 128   ;;  %s7585_s28 = smov 8  }
  0x3a   : > { %5873 = dma.hbm_to_vmem [thread:$0]  (!%p6340_p7), %s6353_s20, 256, %s6357_s27, %s6359_s25, %s7583_s17, %s7583_s17, %s7585_s28  }
  0x3b   : > { %s7620_s29 = sshll.u32 %s6335_s30, 4  ;;  %s6397_s19 = sadd.s32 4294967295, %s6210_s26  }
  0x3c   : > { %s471_s16 = scalar_lea.vmem [#allocation8], %s7620_s29  ;;  %s4590_s12 = sadd.s32 4294967294, %s6210_s26  }
  0x3d   : > { %s484_s18 = sshll.u32 %s471_s16, 4  ;;  %p66_p1 = scmp.ne.s32.totalorder %s6194_s22, %s6190_s21  ;;  %s6394_s18 = int_to_ptr.vmem [resolvable:$true] %s484_s18 }
  0x3e   : > { %p7594_p3 = scmp.eq.s32.totalorder %s6397_s19, 0  ;;  %p353_p11 = scmp.eq.s32.totalorder %s6397_s19, 1 }
  0x3f   : > { %p359_p0 = scmp.eq.s32.totalorder %s4590_s12, 1  ;;  %p4591_p4 = scmp.ge.s32.totalorder %s6210_s26, 1 }
  0x40   : > { %p6406_p2 = por %p7594_p3, %p66_p1  ;;  %p7622_p5 = scmp.ne.s32.totalorder %s6198_s23, %s6194_s22 }
  0x41   : > { %p6418_p8 = por %p359_p0, %p66_p1  ;;  %p366_p10 = scmp.lt.s32.totalorder %s6210_s26, 3 }
  0x42   : > { %s7621_s27 = scalar_select %p6406_p2, 1, 0 }
  0x43   : > { %p6414_p6 = por %p353_p11, %p7622_p5  ;;  %p6423_p12 = pnand %p4591_p4, %p366_p10 }
  0x44   : > { %s7625_s29 = scalar_select %p6418_p8, 1, 0 }
  0x45   : > { %s7623_s20 = scalar_select %p6414_p6, 1, 0 }
  0x46   : > { %7626 = sst [smem:[#allocation24_spill]] %s7625_s29  ;;  %s6215_s12 = smov [#allocation9]  }
  0x47   : > { %7624 = sst [smem:[#allocation23_spill]] %s7623_s20  ;;  %s387_s17 = sshll.u32 %s6215_s12, 4  ;;  %s6427_s17 = int_to_ptr.vmem [resolvable:$true] %s387_s17 }
  0x48   : > { %s7627_s16 = scalar_select %p6423_p12, 1, 0 }
  0x49   : > { %p5863_p13 = pneg %p6423_p12  ;;  %s4594_s28 = sshll.u32 %s6335_s30, 8 }
  0x4a   : > { %s6436_s21 = scalar_lea.hbm %s7565_s0, %s6338_s13  ;;  %s420_s29 = scalar_lea.vmem [#allocation3], %s4594_s28 }
  0x4b   : > { %p6440_p1 = pnand %p5863_p13, %p7594_p3  ;;  %s430_s20 = sshll.u32 %s420_s29, 4  ;;  %s6445_s20 = int_to_ptr.vmem [resolvable:$true] %s430_s20 }
  0x4c   : > { %s6032_s10 = scalar_lea.hbm %s7571_s6, 2304 }
  0x4d   : > { %p6033_p11 = scmp.ne.s32.totalorder %s7571_s6, %s6032_s10  ;;  %p6034_p0 = pneg %p6440_p1 }
  0x4e   : > { %p6039_p10 = scmp.lt.u32.totalorder %s6032_s10, %s7571_s6 }
  0x4f   : > { %p6035_p4 = pnand %p6034_p0, %p6033_p11 }
  0x51   : > { %p6036_p5 = pneg %p6035_p4 }
  0x53   : > { %p6041_p13 = pnand %p6039_p10, %p6036_p5 }
  0x55   : > { %6044 = shalt.err (!%p6041_p13)
}
  0x56   : > { %s6045_s28 = scalar_lea.vmem %s6427_s17, 2304  ;;  %p6053_p2 = scmp.lt.s32.totalorder %s6427_s17, %s6427_s17 }
  0x57   : > { %p6046_p3 = scmp.ne.s32.totalorder %s6427_s17, %s6045_s28  ;;  %p6054_p12 = scmp.lt.s32.totalorder %s6045_s28, %s6045_s28 }
  0x59   : > { %p6048_p8 = pnand %p6046_p3, %p6034_p0  ;;  %p6055_p7 = por %p6054_p12, %p6053_p2 }
  0x5b   : > { %p6049_p6 = pneg %p6048_p8 }
  0x5d   : > { %p6056_p9 = pnand %p6055_p7, %p6049_p6 }
  0x5f   : > { %6059 = shalt.err (!%p6056_p9)
}
  0x60   : > { %s6216_s7 = smov 64   ;;  %s6217_s8 = smov 4  }
  0x61   : > { %5866 = dma.hbm_to_vmem [thread:$0]  (!%p6440_p1), %s7571_s6, 2304, %s6427_s17, [#allocation10], %s6216_s7, %s6216_s7, %s6217_s8  }
  0x62   : > { %s417_s29 = scalar_lea.sflag [#allocation4], %s6335_s30  ;;  %s6060_s12 = scalar_lea.hbm %s6436_s21, 4096 }
  0x63   : > { %p6061_p3 = scmp.ne.s32.totalorder %s6436_s21, %s6060_s12  ;;  %p7629_p7 = scmp.ne.s32.totalorder %s7619_s15, 0 }
  0x64   : > { %s6065_s28 = scalar_lea.hbm %s7565_s0, 8192  ;;  %p6066_p6 = scmp.lt.u32.totalorder %s6436_s21, %s7565_s0 }
  0x65   : > { %p6063_p9 = pnand %p6061_p3, %p7629_p7  ;;  %p6067_p8 = scmp.lt.u32.totalorder %s6065_s28, %s6060_s12 }
  0x66   : > { %p6069_p11 = scmp.lt.u32.totalorder %s6060_s12, %s6436_s21 }
  0x67   : > { %p6064_p2 = pneg %p6063_p9  ;;  %p6068_p12 = por %p6067_p8, %p6066_p6 }
  0x69   : > { %p6070_p0 = por %p6069_p11, %p6068_p12 }
  0x6b   : > { %p6071_p4 = pnand %p6070_p0, %p6064_p2 }
  0x6d   : > { %6074 = shalt.err (!%p6071_p4)
}
  0x6e   : > { %s6075_s26 = scalar_lea.vmem %s6445_s20, 4096  ;;  %s6218_s17 = smov [#allocation3]  }
  0x6f   : > { %p6076_p1 = scmp.ne.s32.totalorder %s6445_s20, %s6075_s26  ;;  %s6080_s7 = sshll.u32 %s6218_s17, 4  ;;  %s6081_s7 = int_to_ptr.vmem [resolvable:$false] %s6080_s7 }
  0x70   : > { %s6082_s9 = scalar_lea.vmem %s6081_s7, 8192  ;;  %p6083_p13 = scmp.lt.s32.totalorder %s6445_s20, %s6081_s7 }
  0x71   : > { %p6078_p5 = pnand %p6076_p1, %p7629_p7  ;;  %p6084_p3 = scmp.lt.s32.totalorder %s6082_s9, %s6075_s26 }
  0x73   : > { %p6079_p10 = pneg %p6078_p5  ;;  %p6085_p9 = por %p6084_p3, %p6083_p13 }
  0x75   : > { %p6086_p6 = pnand %p6085_p9, %p6079_p10 }
  0x77   : > { %6089 = shalt.err (!%p6086_p6)
}
  0x78   : > { %p7630_p2 = scmp.ne.s32.totalorder %s7616_s14, 0  ;;  %s7631_s24 = smov 8  }
  0x79   : > { %s7632_s8 = smov 128   ;;  %s7633_s10 = sadd.s32 3840, %s6338_s13 }
  0x7a   : > { %5870 = dma.hbm_to_vmem [thread:$0]  (!%p7630_p2), %s6436_s21, 4096, %s6445_s20, %s417_s29, %s7632_s8, %s7632_s8, %s7631_s24  }
  0x7b   : > { %s6500_s1 = scalar_lea.hbm %s7567_s2, %s7633_s10  ;;  %s6095_s26 = scalar_lea.hbm %s7567_s2, 8192 }
  0x7c   : > { %s6090_s23 = scalar_lea.hbm %s6500_s1, 256  ;;  %p6096_p0 = scmp.lt.u32.totalorder %s6500_s1, %s7567_s2 }
  0x7d   : > { %p6091_p8 = scmp.ne.s32.totalorder %s6500_s1, %s6090_s23  ;;  %p6097_p4 = scmp.lt.u32.totalorder %s6095_s26, %s6090_s23 }
  0x7e   : > { %p6099_p5 = scmp.lt.u32.totalorder %s6090_s23, %s6500_s1 }
  0x7f   : > { %p6093_p12 = pnand %p6091_p8, %p7629_p7  ;;  %p6098_p1 = por %p6097_p4, %p6096_p0 }
  0x81   : > { %p6094_p11 = pneg %p6093_p12  ;;  %p6100_p10 = por %p6099_p5, %p6098_p1 }
  0x83   : > { %p6101_p13 = pnand %p6100_p10, %p6094_p11 }
  0x85   : > { %6104 = shalt.err (!%p6101_p13)
}
  0x86   : > { %s6105_s20 = scalar_lea.vmem %s6394_s18, 256  ;;  %s6219_s29 = smov [#allocation8]  }
  0x87   : > { %p6106_p3 = scmp.ne.s32.totalorder %s6394_s18, %s6105_s20  ;;  %s6110_s17 = sshll.u32 %s6219_s29, 4  ;;  %s6111_s17 = int_to_ptr.vmem [resolvable:$false] %s6110_s17 }
  0x88   : > { %s6112_s7 = scalar_lea.vmem %s6111_s17, 512  ;;  %p6113_p8 = scmp.lt.s32.totalorder %s6394_s18, %s6111_s17 }
  0x89   : > { %p6108_p9 = pnand %p6106_p3, %p7629_p7  ;;  %p6114_p12 = scmp.lt.s32.totalorder %s6112_s7, %s6105_s20 }
  0x8b   : > { %p6109_p6 = pneg %p6108_p9  ;;  %p6115_p0 = por %p6114_p12, %p6113_p8 }
  0x8d   : > { %p6116_p4 = pnand %p6115_p0, %p6109_p6 }
  0x8f   : > { %6119 = shalt.err (!%p6116_p4)
}
  0x90   : > { %5876 = dma.hbm_to_vmem [thread:$0]  (!%p7630_p2), %s6500_s1, 256, %s6394_s18, %s6359_s25, %s7632_s8, %s7632_s8, %s7631_s24  }
  0x91   : > { %p7634_p7 = scmp.ne.s32.totalorder %s7627_s16, 0 }
  0x92   : > { %s6530_s15 = sand.u32 (!%p7634_p7), 1, %s6194_s22   ;;  %p7635_p11 = scmp.ne.s32.totalorder (!%p7634_p7), %s7621_s27, 0 }
  0x93   : > { %496 = sbr.rel (%p7634_p7) target bundleno = 1282 (0x502), region = 68  ;;  %s4604_s9 = sshll.u32 (!%p7634_p7), %s6530_s15, 8 }
  0x94   : > { %s499_s10 = scalar_lea.sflag (!%p7634_p7), [#allocation4], %s6530_s15  ;;  %s6534_s11 = scalar_lea.vmem (!%p7634_p7), [#allocation3], %s4604_s9 }
  0x9a   : > { %6173 = dma.done.wait (%p7635_p11), %s499_s10, 4096  }
  0x9b   : > { %6175 = vsyncadd (%p7635_p11), %s499_s10, 4294963200  ;;  %s507_s25 = sand.u32 1, %s6397_s19   ;;  %s4605_s14 = sshll.u32 %s6530_s15, 4 }
  0x9c   : > { %s508_s18 = scalar_lea.sflag [#allocation7], %s507_s25  ;;  %s511_s16 = scalar_lea.vmem [#allocation6], %s4605_s14 }
  0x9d   : > { %6177 = dma.done.wait (%p7635_p11), %s508_s18, 512  }
  0x9e   : > { %6179 = vsyncadd (%p7635_p11), %s508_s18, 4294966784  ;;  %s6546_s24 = scalar_lea.vmem [#allocation8], %s4605_s14  ;;  %p7636_p2 = scmp.eq.s32.totalorder %s6397_s19, 0 }
  0xa0   : > { %6181 = dma.done.wait (%p7636_p2), [#allocation10], 2304   ;;  %p7637_p1 = pmov %p7636_p2 }
  0xa1   : > { %v5942_v0 = vld [vmem:[%s7568_s3] sm:$0xff]   ;;  %v5943_v1 = vld [vmem:[%s7568_s3 + $0x8] sm:$0xff]   ;;  %v5944_v2 = vld [vmem:[%s7568_s3 + $0x10] sm:$0xff]   ;;  %vm1238_vm0 = vcmask 261120   ;;  %v6220_v63 = vmov 0.0|0.0   ;;  %vm1217_vm1 = vcmask 1040384  }
  0xa2   : > { %6183 = vsyncadd (%p7637_p1), [#allocation10], 4294964992  ;;  %5179 = vmatprep.subr.bf16.mxu0 %v5942_v0  ;;  %v5945_v3 = vld [vmem:[%s7568_s3 + $0x18] sm:$0xff]   ;;  %v624_v4 = vld [vmem:[%s511_s16] sm:$0xff]  ;;  %1258 = vst.msk [vmem:[#allocation2 + $0x90] sm:$0xff] %vm1238_vm0, %v6220_v63  ;;  %vm1330_vm4 = vcmask 1047552  }
  0xa3   : > { %5180 = vmatpush3.bf16.msra.mxu0 %v5942_v0  ;;  %v625_v5 = vld [vmem:[%s511_s16 + $0x8] sm:$0xff]  ;;  %v5946_v7 = vld [vmem:[%s7568_s3 + $0x20] sm:$0xff]   ;;  %v5948_v9 = vld [vmem:[%s7568_s3 + $0x30] sm:$0xff]   ;;  %1275 = vst.msk [vmem:[#allocation2 + $0x118] sm:$0xff] %vm1238_vm0, %v6220_v63  ;;  %vm1218_vm2 = vsmask.f32 256 }
  0xa4   : > { %5181 = vmatprep.subr.bf16.mxu0 %v5943_v1  ;;  %v628_v6 = vpack.c.bf16 %v625_v5, %v624_v4  ;;  %v5947_v8 = vld [vmem:[%s7568_s3 + $0x28] sm:$0xff]   ;;  %v5949_v10 = vld [vmem:[%s7568_s3 + $0x38] sm:$0xff]   ;;  %v592_v11 = vld [vmem:[%s6534_s11] sm:$0xff]  ;;  %v6221_v5 = vmov 0   ;;  %vm1331_vm5 = vsmask.f32 7424 }
  0xa5   : > { %v593_v12 = vld [vmem:[%s6534_s11 + $0x8] sm:$0xff]  ;;  %v594_v13 = vld [vmem:[%s6534_s11 + $0x10] sm:$0xff]  ;;  %v595_v14 = vld [vmem:[%s6534_s11 + $0x18] sm:$0xff]  ;;  %s7642_s8 = sld [smem:[#allocation28_spill]]  ;;  %s7643_s30 = sld [smem:[#allocation26_spill]] }
  0xa6   : > { %5195 = vmatprep.mubr.bf16.mxu0 %v628_v6  ;;  %v629_v15 = vpack.c.bf16 %v593_v12, %v592_v11  ;;  %v630_v16 = vpack.c.bf16 %v595_v14, %v594_v13  ;;  %v596_v17 = vld [vmem:[%s6534_s11 + $0x20] sm:$0xff]  ;;  %v597_v18 = vld [vmem:[%s6534_s11 + $0x28] sm:$0xff]  ;;  %v598_v19 = vld [vmem:[%s6534_s11 + $0x30] sm:$0xff]  ;;  %v1076_v6 = vrot.slane %v6221_v5, 7  ;;  %s7644_s26 = sld [smem:[#allocation27_spill]]  ;;  %s7645_s20 = sld [smem:[#allocation29_spill]] }
  0xa7   : > { %5182 = vmatpush3.bf16.msra.mxu0 %v5943_v1  ;;  %v599_v20 = vld [vmem:[%s6534_s11 + $0x38] sm:$0xff]  ;;  %v631_v21 = vpack.c.bf16 %v597_v18, %v596_v17  ;;  %v600_v23 = vld [vmem:[%s6534_s11 + $0x40] sm:$0xff]  ;;  %v601_v24 = vld [vmem:[%s6534_s11 + $0x48] sm:$0xff]  ;;  %s7646_s7 = sld [smem:[#allocation30_spill]]  ;;  %s4608_s9 = sshll.u32 %s6530_s15, 7 }
  0xa8   : > { %5183 = vmatprep.subr.bf16.mxu0 %v5944_v2  ;;  %v632_v22 = vpack.c.bf16 %v599_v20, %v598_v19  ;;  %v602_v25 = vld [vmem:[%s6534_s11 + $0x50] sm:$0xff]  ;;  %v603_v26 = vld [vmem:[%s6534_s11 + $0x58] sm:$0xff]  ;;  %v633_v27 = vpack.c.bf16 %v601_v24, %v600_v23  ;;  %v604_v29 = vld [vmem:[%s6534_s11 + $0x60] sm:$0xff]  ;;  %s7413_s10 = scalar_lea.vmem [#allocation11], %s4608_s9  ;;  %s7647_s25 = sld [smem:[#allocation18_spill]] }
  0xa9   : > { %v634_v28 = vpack.c.bf16 %v603_v26, %v602_v25  ;;  %v605_v30 = vld [vmem:[%s6534_s11 + $0x68] sm:$0xff]  ;;  %v606_v31 = vld [vmem:[%s6534_s11 + $0x70] sm:$0xff]  ;;  %v607_v32 = vld [vmem:[%s6534_s11 + $0x78] sm:$0xff]  ;;  %s7648_s14 = sld [smem:[#allocation23_spill]]  ;;  %s4443_s16 = sshll.u32 %s7413_s10, 4  ;;  %s7514_s16 = int_to_ptr.vmem [resolvable:$true] %s4443_s16 }
  0xaa   : > { %v635_v33 = vpack.c.bf16 %v605_v30, %v604_v29  ;;  %v636_v34 = vpack.c.bf16 %v607_v32, %v606_v31  ;;  %v608_v35 = vld [vmem:[%s6534_s11 + $0x80] sm:$0xff]  ;;  %v609_v36 = vld [vmem:[%s6534_s11 + $0x88] sm:$0xff]  ;;  %v610_v37 = vld [vmem:[%s6534_s11 + $0x90] sm:$0xff]  ;;  %s7649_s1 = sld [smem:[#allocation31_spill]]  ;;  %s6120_s27 = scalar_lea.vmem %s7514_s16, 2048 }
  0xab   : > { %5184 = vmatpush3.bf16.msra.mxu0 %v5944_v2  ;;  %v611_v38 = vld [vmem:[%s6534_s11 + $0x98] sm:$0xff]  ;;  %v637_v39 = vpack.c.bf16 %v609_v36, %v608_v35  ;;  %v612_v41 = vld [vmem:[%s6534_s11 + $0xa0] sm:$0xff]  ;;  %v613_v42 = vld [vmem:[%s6534_s11 + $0xa8] sm:$0xff]  ;;  %p6121_p5 = scmp.ne.s32.totalorder %s7514_s16, %s6120_s27 }
  0xac   : > { %5185 = vmatprep.subr.bf16.mxu0 %v5945_v3  ;;  %v638_v40 = vpack.c.bf16 %v611_v38, %v610_v37  ;;  %v614_v43 = vld [vmem:[%s6534_s11 + $0xb0] sm:$0xff]  ;;  %v615_v44 = vld [vmem:[%s6534_s11 + $0xb8] sm:$0xff]  ;;  %v639_v45 = vpack.c.bf16 %v613_v42, %v612_v41  ;;  %v616_v47 = vld [vmem:[%s6534_s11 + $0xc0] sm:$0xff] }
  0xad   : > { %v640_v46 = vpack.c.bf16 %v615_v44, %v614_v43  ;;  %v617_v48 = vld [vmem:[%s6534_s11 + $0xc8] sm:$0xff]  ;;  %v618_v49 = vld [vmem:[%s6534_s11 + $0xd0] sm:$0xff]  ;;  %v619_v50 = vld [vmem:[%s6534_s11 + $0xd8] sm:$0xff] }
  0xae   : > { %v641_v51 = vpack.c.bf16 %v617_v48, %v616_v47  ;;  %v642_v52 = vpack.c.bf16 %v619_v50, %v618_v49  ;;  %v620_v53 = vld [vmem:[%s6534_s11 + $0xe0] sm:$0xff]  ;;  %v621_v54 = vld [vmem:[%s6534_s11 + $0xe8] sm:$0xff]  ;;  %v622_v55 = vld [vmem:[%s6534_s11 + $0xf0] sm:$0xff]  ;;  %s4876_s18 = sshll.u32 %s7647_s25, 11 }
  0xaf   : > { %5186 = vmatpush3.bf16.msra.mxu0 %v5945_v3  ;;  %v623_v56 = vld [vmem:[%s6534_s11 + $0xf8] sm:$0xff]  ;;  %v643_v57 = vpack.c.bf16 %v621_v54, %v620_v53  ;;  %v626_v59 = vld [vmem:[%s6546_s24] sm:$0xff]  ;;  %vm6624_vm3 = vmand %vm1217_vm1, %vm1218_vm2  ;;  %p7650_p10 = scmp.ne.s32.totalorder %s7648_s14, 0 }
  0xb0   : > { %5187 = vmatprep.subr.bf16.mxu0 %v5946_v7  ;;  %v644_v58 = vpack.c.bf16 %v623_v56, %v622_v55  ;;  %v627_v60 = vld [vmem:[%s6546_s24 + $0x8] sm:$0xff]  ;;  %v5950_v62 = vld [vmem:[#allocation9 + $0x10] sm:$0xff]   ;;  %v1390_v1 = vld [vmem:[#allocation2 + $0x90] sm:$0xff]  ;;  %s7512_s23 = scalar_lea.hbm %s7649_s1, %s4876_s18 }
  0xb1   : > { %v645_v61 = vpack.c.bf16 %v627_v60, %v626_v59  ;;  %v5951_v0 = vld [vmem:[#allocation9 + $0x18] sm:$0xff]   ;;  %v6613_v2 = vld [vmem:[#allocation9 + $0x30] sm:$0xff]   ;;  %v6621_v4 = vld [vmem:[#allocation9 + $0x40] sm:$0xff]   ;;  %p6122_p13 = pnand %p6121_p5, %p7650_p10 }
  0xb2   : > { %5591 = vmatprep.subr.bf16.mxu1 %v6613_v2  ;;  %v6617_v3 = vld [vmem:[#allocation9 + $0x38] sm:$0xff]   ;;  %v6643_v11 = vld [vmem:[%s7570_s5] ss:$0 sm:$0xff]  ;;  %vm6652_vm6 = vmand %vm1330_vm4, %vm1331_vm5 }
  0xb3   : > { %5188 = vmatpush3.bf16.msra.mxu0 %v5946_v7  ;;  %5593 = vmatpush3.bf16.msra.mxu1 %v6613_v2  ;;  %v5957_v54 = vld [vmem:[#allocation9 + $0x8] sm:$0xff]   ;;  %p6123_p3 = pneg %p6122_p13 }
  0xb4   : > { %5189 = vmatprep.subr.bf16.mxu0 %v5947_v8  ;;  %5592 = vmatprep.subr.bf16.mxu1 %v6617_v3 }
  0xb7   : > { %5190 = vmatpush3.bf16.msra.mxu0 %v5947_v8  ;;  %5594 = vmatpush3.bf16.msra.mxu1 %v6617_v3  ;;  %v6628_v8 = vld [vmem:[#allocation9] sm:$0xff]  }
  0xb8   : > { %5191 = vmatprep.subr.bf16.mxu0 %v5948_v9  ;;  %5375 = vmatprep.subr.bf16.mxu1 %v6621_v4 }
  0xbb   : > { %5192 = vmatpush3.bf16.msra.mxu0 %v5948_v9  ;;  %v1220_v9 = vsel %vm6624_vm3, 0, %v1076_v6 }
  0xbc   : > { %5193 = vmatprep.subr.bf16.mxu0 %v5949_v10  ;;  %1239 = vst.msk [vmem:[#allocation2] sm:$0xff] %vm1238_vm0, %v1220_v9  ;;  %1256 = vst.msk [vmem:[#allocation2 + $0x88] sm:$0xff] %vm1238_vm0, %v1220_v9 }
  0xbf   : > { %5194 = vmatpush3.bf16.msra.mxu0 %v5949_v10  ;;  %v6638_v10 = vld [vmem:[%s7569_s4] ss:$0 sm:$0xff] }
  0xc0   : > { %5231 = vmatprep.subr.bf16.mxu0 %v5950_v62 }
  0xc2   : > { %5196 = vmatmul.mubr.bf16.vlgmr.msra.gmra.mrb[0].mxu0 %v629_v15 }
  0xc3   : > { %5199 = vmatprep.mubr.bf16.mxu0 %v630_v16  ;;  %5232 = vmatpush3.bf16.msra.mxu0 %v5950_v62 }
  0xc4   : > { %5233 = vmatprep.subr.bf16.mxu0 %v5951_v0 }
  0xc7   : > { %5234 = vmatpush3.bf16.msra.mxu0 %v5951_v0 }
  0xc8   : > { %5267 = vmatprep.subr.bf16.mxu0 %v6628_v8 }
  0xca   : > { %5200 = vmatmul.mubr.bf16.gmra.mrb[4].mxu0 %v631_v21 }
  0xcb   : > { %5203 = vmatprep.mubr.bf16.mxu0 %v632_v22 }
  0xd2   : > { %5204 = vmatmul.mubr.bf16.gmra.mrb[8].mxu0 %v633_v27 }
  0xd3   : > { %5207 = vmatprep.mubr.bf16.mxu0 %v634_v28  ;;  %v1276_v28 = vrot.slane %v6221_v5, 1 }
  0xd5   : > { %v1333_v37 = vsel %vm6652_vm6, %v1276_v28, 0 }
  0xd6   : > { %1352 = vst.msk [vmem:[#allocation2 + $0x120] sm:$0xff] %vm1238_vm0, %v1333_v37  ;;  %1369 = vst.msk [vmem:[#allocation2 + $0x1a8] sm:$0xff] %vm1238_vm0, %v1333_v37 }
  0xda   : > { %5208 = vmatmul.mubr.bf16.gmra.mrb[12].mxu0 %v635_v33 }
  0xdb   : > { %5211 = vmatprep.mubr.bf16.mxu0 %v636_v34 }
  0xe2   : > { %5212 = vmatmul.mubr.bf16.gmra.mrb[16].mxu0 %v637_v39 }
  0xe3   : > { %5215 = vmatprep.mubr.bf16.mxu0 %v638_v40 }
  0xea   : > { %5216 = vmatmul.mubr.bf16.gmra.mrb[20].mxu0 %v639_v45 }
  0xeb   : > { %5219 = vmatprep.mubr.bf16.mxu0 %v640_v46 }
  0xf2   : > { %5220 = vmatmul.mubr.bf16.gmra.mrb[24].mxu0 %v641_v51 }
  0xf3   : > { %5223 = vmatprep.mubr.bf16.mxu0 %v642_v52 }
  0xfa   : > { %5224 = vmatmul.mubr.bf16.gmra.mrb[28].mxu0 %v643_v57 }
  0xfb   : > { %5227 = vmatprep.mubr.bf16.mxu0 %v644_v58 }
 0x102   : > { %5228 = vmatmul.mubr.bf16.gmra.mrb[32].mxu0 %v645_v61 }
 0x103   : > { %5235 = vmatprep.mubr.msk.bf16.mxu0 %vm1238_vm0, %v1390_v1 }
 0x195   : > { %v5197_v12 = vpop.f32.mrb[0].mxu0 }
 0x196   : > { %v895_v13 = vmul.f32 %v5197_v12, %v6638_v10  ;;  %v744_v14 = vpop.f32.mrb[1].mxu0 }
 0x197   : > { %v5198_v15 = vpop.f32.mrb[2].mxu0  ;;  %v6686_v14 = vld [vmem:[#allocation9 + $0x20] sm:$0xff]  }
 0x198   : > { %v937_v16 = vadd.f32 %v6643_v11, %v895_v13  ;;  %v896_v17 = vmul.f32 %v5198_v15, %v6638_v10  ;;  %v747_v18 = vpop.f32.mrb[3].mxu0 }
 0x19a   : > { %v938_v19 = vadd.f32 %v6643_v11, %v896_v17  ;;  %v973_v20 = vmax.f32 %v937_v16, 0.0 }
 0x19c   : > { %v974_v21 = vmax.f32 %v938_v19, 0.0 }
 0x19d   : > { %v5201_v22 = vpop.f32.mrb[4].mxu0 }
 0x19e   : > { %v1056_v23 = vpack.c.bf16 %v974_v21, %v973_v20  ;;  %v899_v24 = vmul.f32 %v5201_v22, %v6638_v10  ;;  %v760_v25 = vpop.f32.mrb[5].mxu0 }
 0x19f   : > { %v897_v26 = vmul.f32 %v6638_v10, %v760_v25  ;;  %v5202_v27 = vpop.f32.mrb[6].mxu0 }
 0x1a0   : > { %v1081_v29 = vshrl.u32 %v1056_v23, 16  ;;  %v1084_v30 = vshll.u32 %v1056_v23, 16  ;;  %1259 = vst.msk [vmem:[#allocation2 + $0x98] sm:$0xff] %vm1238_vm0, %v1056_v23  ;;  %v941_v32 = vadd.f32 %v6643_v11, %v899_v24  ;;  %v900_v33 = vmul.f32 %v5202_v27, %v6638_v10  ;;  %v763_v34 = vpop.f32.mrb[7].mxu0 }
 0x1a1   : > { %v939_v35 = vadd.f32 %v6643_v11, %v897_v26  ;;  %v898_v36 = vmul.f32 %v6638_v10, %v763_v34 }
 0x1a2   : > { %v1083_v38 = vrot.slane %v1081_v29, 7  ;;  %v1278_v39 = vrot.slane %v1084_v30, 1  ;;  %v942_v40 = vadd.f32 %v6643_v11, %v900_v33  ;;  %v977_v44 = vmax.f32 %v941_v32, 0.0 }
 0x1a3   : > { %v940_v41 = vadd.f32 %v6643_v11, %v898_v36  ;;  %v975_v46 = vmax.f32 %v939_v35, 0.0 }
 0x1a4   : > { %v1086_v42 = vor.u32 %v1084_v30, %v1083_v38  ;;  %v1279_v43 = vor.u32 %v1278_v39, %v1081_v29  ;;  %v978_v45 = vmax.f32 %v942_v40, 0.0 }
 0x1a5   : > { %v976_v47 = vmax.f32 %v940_v41, 0.0  ;;  %v5205_v48 = vpop.f32.mrb[8].mxu0 }
 0x1a6   : > { %v1221_v49 = vsel %vm6624_vm3, 0, %v1086_v42  ;;  %v1334_v50 = vsel %vm6652_vm6, %v1279_v43, 0  ;;  %v1058_v51 = vpack.c.bf16 %v978_v45, %v977_v44  ;;  %v903_v52 = vmul.f32 %v5205_v48, %v6638_v10  ;;  %v776_v53 = vpop.f32.mrb[9].mxu0 }
 0x1a7   : > { %1240 = vst.msk [vmem:[#allocation2 + $0x8] sm:$0xff] %vm1238_vm0, %v1221_v49  ;;  %1353 = vst.msk [vmem:[#allocation2 + $0x128] sm:$0xff] %vm1238_vm0, %v1334_v50  ;;  %v1057_v55 = vpack.c.bf16 %v976_v47, %v975_v46  ;;  %v901_v56 = vmul.f32 %v6638_v10, %v776_v53  ;;  %v5206_v57 = vpop.f32.mrb[10].mxu0  ;;  %v6674_v58 = vld [vmem:[#allocation2 + $0x98] sm:$0xff] }
 0x1a8   : > { %v1095_v59 = vshrl.u32 %v1058_v51, 16  ;;  %v1098_v60 = vshll.u32 %v1058_v51, 16  ;;  %1261 = vst.msk [vmem:[#allocation2 + $0xa8] sm:$0xff] %vm1238_vm0, %v1058_v51  ;;  %v945_v61 = vadd.f32 %v6643_v11, %v903_v52  ;;  %v904_v62 = vmul.f32 %v5206_v57, %v6638_v10  ;;  %v779_v63 = vpop.f32.mrb[11].mxu0  ;;  %5236 = vmatmul.mubr.msk.bf16.vlgmr.msra.gmra.mrb[36].mxu0 %vm1238_vm0, %v6674_v58 }
 0x1a9   : > { %v1088_v0 = vshrl.u32 %v1057_v55, 16  ;;  %v1091_v1 = vshll.u32 %v1057_v55, 16  ;;  %1260 = vst.msk [vmem:[#allocation2 + $0xa0] sm:$0xff] %vm1238_vm0, %v1057_v55  ;;  %v943_v5 = vadd.f32 %v6643_v11, %v901_v56  ;;  %v902_v6 = vmul.f32 %v6638_v10, %v779_v63  ;;  %5268 = vmatpush3.bf16.msra.mxu0 %v6628_v8 }
 0x1aa   : > { %v1097_v9 = vrot.slane %v1095_v59, 7  ;;  %v1282_v12 = vrot.slane %v1098_v60, 1  ;;  %v946_v13 = vadd.f32 %v6643_v11, %v904_v62  ;;  %5269 = vmatprep.subr.bf16.mxu0 %v5957_v54  ;;  %v981_v20 = vmax.f32 %v945_v61, 0.0 }
 0x1ab   : > { %v1090_v15 = vrot.slane %v1088_v0, 7  ;;  %v1280_v16 = vrot.slane %v1091_v1, 1  ;;  %v944_v17 = vadd.f32 %v6643_v11, %v902_v6  ;;  %v979_v24 = vmax.f32 %v943_v5, 0.0 }
 0x1ac   : > { %v1100_v18 = vor.u32 %v1098_v60, %v1097_v9  ;;  %v1283_v19 = vor.u32 %v1282_v12, %v1095_v59  ;;  %v982_v21 = vmax.f32 %v946_v13, 0.0 }
 0x1ad   : > { %v1093_v22 = vor.u32 %v1091_v1, %v1090_v15  ;;  %v1281_v23 = vor.u32 %v1280_v16, %v1088_v0  ;;  %v980_v25 = vmax.f32 %v944_v17, 0.0  ;;  %v5209_v8 = vpop.f32.mrb[12].mxu0  ;;  %5270 = vmatpush3.bf16.msra.mxu0 %v5957_v54 }
 0x1ae   : > { %v1223_v26 = vsel %vm6624_vm3, 0, %v1100_v18  ;;  %v1336_v27 = vsel %vm6652_vm6, %v1283_v19, 0  ;;  %v1060_v28 = vpack.c.bf16 %v982_v21, %v981_v20  ;;  %v907_v29 = vmul.f32 %v5209_v8, %v6638_v10  ;;  %v792_v30 = vpop.f32.mrb[13].mxu0  ;;  %5303 = vmatprep.subr.bf16.mxu0 %v6686_v14  ;;  %v6942_v7 = vld [vmem:[#allocation2 + $0x8] sm:$0xff] }
 0x1af   : > { %1242 = vst.msk [vmem:[#allocation2 + $0x18] sm:$0xff] %vm1238_vm0, %v1223_v26  ;;  %1355 = vst.msk [vmem:[#allocation2 + $0x138] sm:$0xff] %vm1238_vm0, %v1336_v27  ;;  %v1222_v32 = vsel %vm6624_vm3, 0, %v1093_v22  ;;  %v1335_v33 = vsel %vm6652_vm6, %v1281_v23, 0  ;;  %v1059_v34 = vpack.c.bf16 %v980_v25, %v979_v24  ;;  %v905_v35 = vmul.f32 %v6638_v10, %v792_v30  ;;  %v5210_v36 = vpop.f32.mrb[14].mxu0  ;;  %v6714_v47 = vld [vmem:[#allocation2 + $0xa8] sm:$0xff] }
 0x1b0   : > { %1241 = vst.msk [vmem:[#allocation2 + $0x10] sm:$0xff] %vm1238_vm0, %v1222_v32  ;;  %1354 = vst.msk [vmem:[#allocation2 + $0x130] sm:$0xff] %vm1238_vm0, %v1335_v33  ;;  %v1109_v37 = vshrl.u32 %v1060_v28, 16  ;;  %v1112_v38 = vshll.u32 %v1060_v28, 16  ;;  %v949_v39 = vadd.f32 %v6643_v11, %v907_v29  ;;  %v908_v40 = vmul.f32 %v5210_v36, %v6638_v10  ;;  %v795_v41 = vpop.f32.mrb[15].mxu0  ;;  %v6707_v42 = vld [vmem:[#allocation2 + $0xa0] sm:$0xff] }
 0x1b1   : > { %1263 = vst.msk [vmem:[#allocation2 + $0xb8] sm:$0xff] %vm1238_vm0, %v1060_v28  ;;  %v1102_v43 = vshrl.u32 %v1059_v34, 16  ;;  %v1105_v44 = vshll.u32 %v1059_v34, 16  ;;  %1262 = vst.msk [vmem:[#allocation2 + $0xb0] sm:$0xff] %vm1238_vm0, %v1059_v34  ;;  %v947_v45 = vadd.f32 %v6643_v11, %v905_v35  ;;  %v906_v46 = vmul.f32 %v6638_v10, %v795_v41  ;;  %5239 = vmatprep.mubr.msk.bf16.mxu0 %vm1238_vm0, %v6707_v42 }
 0x1b2   : > { %v1111_v48 = vrot.slane %v1109_v37, 7  ;;  %v1286_v49 = vrot.slane %v1112_v38, 1  ;;  %v950_v50 = vadd.f32 %v6643_v11, %v908_v40  ;;  %5240 = vmatmul.mubr.msk.bf16.gmra.mrb[40].mxu0 %vm1238_vm0, %v6714_v47  ;;  %v985_v56 = vmax.f32 %v949_v39, 0.0 }
 0x1b3   : > { %v1104_v51 = vrot.slane %v1102_v43, 7  ;;  %v1284_v52 = vrot.slane %v1105_v44, 1  ;;  %v948_v53 = vadd.f32 %v6643_v11, %v906_v46  ;;  %v983_v61 = vmax.f32 %v947_v45, 0.0 }
 0x1b4   : > { %v1114_v54 = vor.u32 %v1112_v38, %v1111_v48  ;;  %v1287_v55 = vor.u32 %v1286_v49, %v1109_v37  ;;  %v986_v57 = vmax.f32 %v950_v50, 0.0 }
 0x1b5   : > { %v1107_v59 = vor.u32 %v1105_v44, %v1104_v51  ;;  %v1285_v60 = vor.u32 %v1284_v52, %v1102_v43  ;;  %v984_v62 = vmax.f32 %v948_v53, 0.0  ;;  %v5213_v63 = vpop.f32.mrb[16].mxu0 }
 0x1b6   : > { %v1225_v0 = vsel %vm6624_vm3, 0, %v1114_v54  ;;  %v1338_v1 = vsel %vm6652_vm6, %v1287_v55, 0  ;;  %v1062_v5 = vpack.c.bf16 %v986_v57, %v985_v56  ;;  %v911_v6 = vmul.f32 %v5213_v63, %v6638_v10  ;;  %v808_v9 = vpop.f32.mrb[17].mxu0 }
 0x1b7   : > { %1244 = vst.msk [vmem:[#allocation2 + $0x28] sm:$0xff] %vm1238_vm0, %v1225_v0  ;;  %1357 = vst.msk [vmem:[#allocation2 + $0x148] sm:$0xff] %vm1238_vm0, %v1338_v1  ;;  %v1224_v12 = vsel %vm6624_vm3, 0, %v1107_v59  ;;  %v1337_v13 = vsel %vm6652_vm6, %v1285_v60, 0  ;;  %v1061_v15 = vpack.c.bf16 %v984_v62, %v983_v61  ;;  %v909_v16 = vmul.f32 %v6638_v10, %v808_v9  ;;  %v5214_v17 = vpop.f32.mrb[18].mxu0  ;;  %v6946_v31 = vld [vmem:[#allocation2 + $0x10] sm:$0xff] }
 0x1b8   : > { %1243 = vst.msk [vmem:[#allocation2 + $0x20] sm:$0xff] %vm1238_vm0, %v1224_v12  ;;  %1356 = vst.msk [vmem:[#allocation2 + $0x140] sm:$0xff] %vm1238_vm0, %v1337_v13  ;;  %v1123_v18 = vshrl.u32 %v1062_v5, 16  ;;  %v1126_v19 = vshll.u32 %v1062_v5, 16  ;;  %v953_v20 = vadd.f32 %v6643_v11, %v911_v6  ;;  %v912_v21 = vmul.f32 %v5214_v17, %v6638_v10  ;;  %v811_v22 = vpop.f32.mrb[19].mxu0  ;;  %v6737_v23 = vld [vmem:[#allocation2 + $0xb0] sm:$0xff] }
 0x1b9   : > { %1265 = vst.msk [vmem:[#allocation2 + $0xc8] sm:$0xff] %vm1238_vm0, %v1062_v5  ;;  %v1116_v24 = vshrl.u32 %v1061_v15, 16  ;;  %v1119_v25 = vshll.u32 %v1061_v15, 16  ;;  %1264 = vst.msk [vmem:[#allocation2 + $0xc0] sm:$0xff] %vm1238_vm0, %v1061_v15  ;;  %v951_v8 = vadd.f32 %v6643_v11, %v909_v16  ;;  %v910_v26 = vmul.f32 %v6638_v10, %v811_v22  ;;  %5243 = vmatprep.mubr.msk.bf16.mxu0 %vm1238_vm0, %v6737_v23  ;;  %v6744_v27 = vld [vmem:[#allocation2 + $0xb8] sm:$0xff] }
 0x1ba   : > { %v1125_v28 = vrot.slane %v1123_v18, 7  ;;  %v1290_v29 = vrot.slane %v1126_v19, 1  ;;  %v954_v30 = vadd.f32 %v6643_v11, %v912_v21  ;;  %5244 = vmatmul.mubr.msk.bf16.gmra.mrb[44].mxu0 %vm1238_vm0, %v6744_v27  ;;  %v989_v37 = vmax.f32 %v953_v20, 0.0 }
 0x1bb   : > { %v1118_v32 = vrot.slane %v1116_v24, 7  ;;  %v1288_v33 = vrot.slane %v1119_v25, 1  ;;  %v952_v34 = vadd.f32 %v6643_v11, %v910_v26  ;;  %v987_v41 = vmax.f32 %v951_v8, 0.0 }
 0x1bc   : > { %v1128_v35 = vor.u32 %v1126_v19, %v1125_v28  ;;  %v1291_v36 = vor.u32 %v1290_v29, %v1123_v18  ;;  %v990_v38 = vmax.f32 %v954_v30, 0.0 }
 0x1bd   : > { %v1121_v39 = vor.u32 %v1119_v25, %v1118_v32  ;;  %v1289_v40 = vor.u32 %v1288_v33, %v1116_v24  ;;  %v988_v43 = vmax.f32 %v952_v34, 0.0  ;;  %v5217_v44 = vpop.f32.mrb[20].mxu0 }
 0x1be   : > { %v1227_v45 = vsel %vm6624_vm3, 0, %v1128_v35  ;;  %v1340_v46 = vsel %vm6652_vm6, %v1291_v36, 0  ;;  %v1064_v48 = vpack.c.bf16 %v990_v38, %v989_v37  ;;  %v915_v49 = vmul.f32 %v5217_v44, %v6638_v10  ;;  %v824_v50 = vpop.f32.mrb[21].mxu0  ;;  %v6755_v51 = vld [vmem:[#allocation2 + $0x28] sm:$0xff] }
 0x1bf   : > { %1246 = vst.msk [vmem:[#allocation2 + $0x38] sm:$0xff] %vm1238_vm0, %v1227_v45  ;;  %1359 = vst.msk [vmem:[#allocation2 + $0x158] sm:$0xff] %vm1238_vm0, %v1340_v46  ;;  %v1226_v52 = vsel %vm6624_vm3, 0, %v1121_v39  ;;  %v1339_v53 = vsel %vm6652_vm6, %v1289_v40, 0  ;;  %v1063_v54 = vpack.c.bf16 %v988_v43, %v987_v41  ;;  %v913_v55 = vmul.f32 %v6638_v10, %v824_v50  ;;  %v5218_v56 = vpop.f32.mrb[22].mxu0  ;;  %5351 = vmatprep.mubr.msk.bf16.mxu1 %vm1238_vm0, %v6755_v51  ;;  %v5955_v41 = vld [vmem:[#allocation9 + $0x48] sm:$0xff]  }
 0x1c0   : > { %1245 = vst.msk [vmem:[#allocation2 + $0x30] sm:$0xff] %vm1238_vm0, %v1226_v52  ;;  %1358 = vst.msk [vmem:[#allocation2 + $0x150] sm:$0xff] %vm1238_vm0, %v1339_v53  ;;  %v1137_v57 = vshrl.u32 %v1064_v48, 16  ;;  %v1140_v59 = vshll.u32 %v1064_v48, 16  ;;  %v957_v60 = vadd.f32 %v6643_v11, %v915_v49  ;;  %v916_v61 = vmul.f32 %v5218_v56, %v6638_v10  ;;  %v827_v62 = vpop.f32.mrb[23].mxu0  ;;  %v6771_v63 = vld [vmem:[#allocation2 + $0xc0] sm:$0xff] }
 0x1c1   : > { %1267 = vst.msk [vmem:[#allocation2 + $0xd8] sm:$0xff] %vm1238_vm0, %v1064_v48  ;;  %v1130_v0 = vshrl.u32 %v1063_v54, 16  ;;  %v1133_v1 = vshll.u32 %v1063_v54, 16  ;;  %1266 = vst.msk [vmem:[#allocation2 + $0xd0] sm:$0xff] %vm1238_vm0, %v1063_v54  ;;  %v955_v5 = vadd.f32 %v6643_v11, %v913_v55  ;;  %v914_v6 = vmul.f32 %v6638_v10, %v827_v62  ;;  %5247 = vmatprep.mubr.msk.bf16.mxu0 %vm1238_vm0, %v6771_v63  ;;  %v6778_v9 = vld [vmem:[#allocation2 + $0xc8] sm:$0xff] }
 0x1c2   : > { %v1139_v12 = vrot.slane %v1137_v57, 7  ;;  %v1294_v13 = vrot.slane %v1140_v59, 1  ;;  %v958_v15 = vadd.f32 %v6643_v11, %v916_v61  ;;  %5248 = vmatmul.mubr.msk.bf16.gmra.mrb[48].mxu0 %vm1238_vm0, %v6778_v9  ;;  %v993_v21 = vmax.f32 %v957_v60, 0.0  ;;  %v6822_v61 = vld [vmem:[#allocation9 + $0x50] sm:$0xff]  }
 0x1c3   : > { %v1132_v16 = vrot.slane %v1130_v0, 7  ;;  %v1292_v17 = vrot.slane %v1133_v1, 1  ;;  %v956_v18 = vadd.f32 %v6643_v11, %v914_v6  ;;  %v991_v8 = vmax.f32 %v955_v5, 0.0 }
 0x1c4   : > { %v1142_v19 = vor.u32 %v1140_v59, %v1139_v12  ;;  %v1295_v20 = vor.u32 %v1294_v13, %v1137_v57  ;;  %v994_v22 = vmax.f32 %v958_v15, 0.0 }
 0x1c5   : > { %v1135_v24 = vor.u32 %v1133_v1, %v1132_v16  ;;  %v1293_v25 = vor.u32 %v1292_v17, %v1130_v0  ;;  %v992_v26 = vmax.f32 %v956_v18, 0.0  ;;  %v5221_v28 = vpop.f32.mrb[24].mxu0 }
 0x1c6   : > { %v1229_v29 = vsel %vm6624_vm3, 0, %v1142_v19  ;;  %v1342_v30 = vsel %vm6652_vm6, %v1295_v20, 0  ;;  %v1066_v32 = vpack.c.bf16 %v994_v22, %v993_v21  ;;  %v919_v33 = vmul.f32 %v5221_v28, %v6638_v10  ;;  %v840_v34 = vpop.f32.mrb[25].mxu0  ;;  %v6813_v55 = vld [vmem:[#allocation2 + $0x38] sm:$0xff] }
 0x1c7   : > { %1248 = vst.msk [vmem:[#allocation2 + $0x48] sm:$0xff] %vm1238_vm0, %v1229_v29  ;;  %1361 = vst.msk [vmem:[#allocation2 + $0x168] sm:$0xff] %vm1238_vm0, %v1342_v30  ;;  %v1228_v35 = vsel %vm6624_vm3, 0, %v1135_v24  ;;  %v1341_v36 = vsel %vm6652_vm6, %v1293_v25, 0  ;;  %v1065_v37 = vpack.c.bf16 %v992_v26, %v991_v8  ;;  %v917_v38 = vmul.f32 %v6638_v10, %v840_v34  ;;  %v5222_v39 = vpop.f32.mrb[26].mxu0  ;;  %v6796_v40 = vld [vmem:[#allocation2 + $0x30] sm:$0xff] }
 0x1c8   : > { %1247 = vst.msk [vmem:[#allocation2 + $0x40] sm:$0xff] %vm1238_vm0, %v1228_v35  ;;  %1360 = vst.msk [vmem:[#allocation2 + $0x160] sm:$0xff] %vm1238_vm0, %v1341_v36  ;;  %v1151_v43 = vshrl.u32 %v1066_v32, 16  ;;  %v1154_v44 = vshll.u32 %v1066_v32, 16  ;;  %v961_v45 = vadd.f32 %v6643_v11, %v919_v33  ;;  %v920_v46 = vmul.f32 %v5222_v39, %v6638_v10  ;;  %v843_v48 = vpop.f32.mrb[27].mxu0  ;;  %5352 = vmatmul.mubr.msk.bf16.vlgmr.msra.gmra.mrb[0].mxu1 %vm1238_vm0, %v6796_v40  ;;  %v6805_v49 = vld [vmem:[#allocation2 + $0xd0] sm:$0xff] }
 0x1c9   : > { %1269 = vst.msk [vmem:[#allocation2 + $0xe8] sm:$0xff] %vm1238_vm0, %v1066_v32  ;;  %v1144_v50 = vshrl.u32 %v1065_v37, 16  ;;  %v1147_v52 = vshll.u32 %v1065_v37, 16  ;;  %1268 = vst.msk [vmem:[#allocation2 + $0xe0] sm:$0xff] %vm1238_vm0, %v1065_v37  ;;  %v959_v53 = vadd.f32 %v6643_v11, %v917_v38  ;;  %v918_v54 = vmul.f32 %v6638_v10, %v843_v48  ;;  %5376 = vmatpush3.bf16.msra.mxu1 %v6621_v4  ;;  %v6815_v56 = vld [vmem:[#allocation2 + $0xd8] sm:$0xff] }
 0x1ca   : > { %5251 = vmatprep.mubr.msk.bf16.mxu0 %vm1238_vm0, %v6805_v49  ;;  %v1153_v57 = vrot.slane %v1151_v43, 7  ;;  %v1298_v59 = vrot.slane %v1154_v44, 1  ;;  %v962_v60 = vadd.f32 %v6643_v11, %v920_v46  ;;  %5355 = vmatprep.mubr.msk.bf16.mxu1 %vm1238_vm0, %v6813_v55  ;;  %v997_v6 = vmax.f32 %v961_v45, 0.0 }
 0x1cb   : > { %5252 = vmatmul.mubr.msk.bf16.gmra.mrb[52].mxu0 %vm1238_vm0, %v6815_v56  ;;  %v1146_v4 = vrot.slane %v1144_v50, 7  ;;  %v1296_v62 = vrot.slane %v1147_v52, 1  ;;  %v960_v0 = vadd.f32 %v6643_v11, %v918_v54  ;;  %5377 = vmatprep.subr.bf16.mxu1 %v5955_v41  ;;  %v995_v16 = vmax.f32 %v959_v53, 0.0 }
 0x1cc   : > { %v1156_v1 = vor.u32 %v1154_v44, %v1153_v57  ;;  %v1299_v5 = vor.u32 %v1298_v59, %v1151_v43  ;;  %v998_v12 = vmax.f32 %v962_v60, 0.0 }
 0x1cd   : > { %v1149_v13 = vor.u32 %v1147_v52, %v1146_v4  ;;  %v1297_v15 = vor.u32 %v1296_v62, %v1144_v50  ;;  %v996_v17 = vmax.f32 %v960_v0, 0.0  ;;  %v5225_v18 = vpop.f32.mrb[28].mxu0  ;;  %5378 = vmatpush3.bf16.msra.mxu1 %v5955_v41 }
 0x1ce   : > { %v1231_v19 = vsel %vm6624_vm3, 0, %v1156_v1  ;;  %v1344_v20 = vsel %vm6652_vm6, %v1299_v5, 0  ;;  %v1068_v21 = vpack.c.bf16 %v998_v12, %v997_v6  ;;  %v923_v22 = vmul.f32 %v5225_v18, %v6638_v10  ;;  %v856_v24 = vpop.f32.mrb[29].mxu0  ;;  %5411 = vmatprep.subr.bf16.mxu1 %v6822_v61  ;;  %v6849_v38 = vld [vmem:[#allocation2 + $0x48] sm:$0xff] }
 0x1cf   : > { %1250 = vst.msk [vmem:[#allocation2 + $0x58] sm:$0xff] %vm1238_vm0, %v1231_v19  ;;  %1363 = vst.msk [vmem:[#allocation2 + $0x178] sm:$0xff] %vm1238_vm0, %v1344_v20  ;;  %v1230_v25 = vsel %vm6624_vm3, 0, %v1149_v13  ;;  %v1343_v8 = vsel %vm6652_vm6, %v1297_v15, 0  ;;  %v1067_v26 = vpack.c.bf16 %v996_v17, %v995_v16  ;;  %v921_v28 = vmul.f32 %v6638_v10, %v856_v24  ;;  %v5226_v29 = vpop.f32.mrb[30].mxu0  ;;  %v6838_v30 = vld [vmem:[#allocation2 + $0x40] sm:$0xff] }
 0x1d0   : > { %1249 = vst.msk [vmem:[#allocation2 + $0x50] sm:$0xff] %vm1238_vm0, %v1230_v25  ;;  %1362 = vst.msk [vmem:[#allocation2 + $0x170] sm:$0xff] %vm1238_vm0, %v1343_v8  ;;  %v1165_v32 = vshrl.u32 %v1068_v21, 16  ;;  %v1168_v33 = vshll.u32 %v1068_v21, 16  ;;  %v965_v34 = vadd.f32 %v6643_v11, %v923_v22  ;;  %v924_v35 = vmul.f32 %v5226_v29, %v6638_v10  ;;  %v859_v36 = vpop.f32.mrb[31].mxu0  ;;  %5356 = vmatmul.mubr.msk.bf16.gmra.mrb[4].mxu1 %vm1238_vm0, %v6838_v30  ;;  %v6847_v37 = vld [vmem:[#allocation2 + $0xe0] sm:$0xff] }
 0x1d1   : > { %1271 = vst.msk [vmem:[#allocation2 + $0xf8] sm:$0xff] %vm1238_vm0, %v1068_v21  ;;  %v1158_v39 = vshrl.u32 %v1067_v26, 16  ;;  %v1161_v41 = vshll.u32 %v1067_v26, 16  ;;  %1270 = vst.msk [vmem:[#allocation2 + $0xf0] sm:$0xff] %vm1238_vm0, %v1067_v26  ;;  %v963_v43 = vadd.f32 %v6643_v11, %v921_v28  ;;  %v922_v44 = vmul.f32 %v6638_v10, %v859_v36  ;;  %5255 = vmatprep.mubr.msk.bf16.mxu0 %vm1238_vm0, %v6847_v37  ;;  %v6858_v45 = vld [vmem:[#allocation2 + $0xe8] sm:$0xff] }
 0x1d2   : > { %5359 = vmatprep.mubr.msk.bf16.mxu1 %vm1238_vm0, %v6849_v38  ;;  %v1167_v46 = vrot.slane %v1165_v32, 7  ;;  %v1302_v48 = vrot.slane %v1168_v33, 1  ;;  %v966_v50 = vadd.f32 %v6643_v11, %v924_v35  ;;  %v1001_v60 = vmax.f32 %v965_v34, 0.0 }
 0x1d3   : > { %5256 = vmatmul.mubr.msk.bf16.gmra.mrb[56].mxu0 %vm1238_vm0, %v6858_v45  ;;  %v1160_v52 = vrot.slane %v1158_v39, 7  ;;  %v1300_v53 = vrot.slane %v1161_v41, 1  ;;  %v964_v54 = vadd.f32 %v6643_v11, %v922_v44  ;;  %v999_v1 = vmax.f32 %v963_v43, 0.0 }
 0x1d4   : > { %v1170_v57 = vor.u32 %v1168_v33, %v1167_v46  ;;  %v1303_v59 = vor.u32 %v1302_v48, %v1165_v32  ;;  %v1002_v4 = vmax.f32 %v966_v50, 0.0 }
 0x1d5   : > { %v1163_v62 = vor.u32 %v1161_v41, %v1160_v52  ;;  %v1301_v0 = vor.u32 %v1300_v53, %v1158_v39  ;;  %v1000_v5 = vmax.f32 %v964_v54, 0.0  ;;  %v5229_v6 = vpop.f32.mrb[32].mxu0 }
 0x1d6   : > { %v1233_v12 = vsel %vm6624_vm3, 0, %v1170_v57  ;;  %v1346_v13 = vsel %vm6652_vm6, %v1303_v59, 0  ;;  %v1070_v15 = vpack.c.bf16 %v1002_v4, %v1001_v60  ;;  %v872_v16 = vpop.f32.mrb[33].mxu0  ;;  %v6884_v28 = vld [vmem:[#allocation2 + $0x58] sm:$0xff] }
 0x1d7   : > { %1252 = vst.msk [vmem:[#allocation2 + $0x68] sm:$0xff] %vm1238_vm0, %v1233_v12  ;;  %1365 = vst.msk [vmem:[#allocation2 + $0x188] sm:$0xff] %vm1238_vm0, %v1346_v13  ;;  %v1232_v17 = vsel %vm6624_vm3, 0, %v1163_v62  ;;  %v1345_v18 = vsel %vm6652_vm6, %v1301_v0, 0  ;;  %v1069_v19 = vpack.c.bf16 %v1000_v5, %v999_v1  ;;  %v925_v20 = vmul.f32 %v6638_v10, %v872_v16  ;;  %v5230_v21 = vpop.f32.mrb[34].mxu0  ;;  %v6875_v22 = vld [vmem:[#allocation2 + $0x50] sm:$0xff] }
 0x1d8   : > { %1251 = vst.msk [vmem:[#allocation2 + $0x60] sm:$0xff] %vm1238_vm0, %v1232_v17  ;;  %1364 = vst.msk [vmem:[#allocation2 + $0x180] sm:$0xff] %vm1238_vm0, %v1345_v18  ;;  %v1179_v24 = vshrl.u32 %v1070_v15, 16  ;;  %v1182_v25 = vshll.u32 %v1070_v15, 16  ;;  %v875_v8 = vpop.f32.mrb[35].mxu0  ;;  %5360 = vmatmul.mubr.msk.bf16.gmra.mrb[8].mxu1 %vm1238_vm0, %v6875_v22  ;;  %v6882_v26 = vld [vmem:[#allocation2 + $0xf0] sm:$0xff] }
 0x1d9   : > { %1273 = vst.msk [vmem:[#allocation2 + $0x108] sm:$0xff] %vm1238_vm0, %v1070_v15  ;;  %v1172_v29 = vshrl.u32 %v1069_v19, 16  ;;  %v1175_v32 = vshll.u32 %v1069_v19, 16  ;;  %1272 = vst.msk [vmem:[#allocation2 + $0x100] sm:$0xff] %vm1238_vm0, %v1069_v19  ;;  %v967_v33 = vadd.f32 %v6643_v11, %v925_v20  ;;  %v926_v34 = vmul.f32 %v6638_v10, %v875_v8  ;;  %5259 = vmatprep.mubr.msk.bf16.mxu0 %vm1238_vm0, %v6882_v26  ;;  %v6893_v35 = vld [vmem:[#allocation2 + $0xf8] sm:$0xff]  ;;  %v1370_v1 = vld [vmem:[#allocation2] sm:$0xff] }
 0x1da   : > { %5363 = vmatprep.mubr.msk.bf16.mxu1 %vm1238_vm0, %v6884_v28  ;;  %v1181_v36 = vrot.slane %v1179_v24, 7  ;;  %v1306_v39 = vrot.slane %v1182_v25, 1  ;;  %v6958_v8 = vld [vmem:[#allocation2 + $0x18] sm:$0xff] }
 0x1db   : > { %5260 = vmatmul.mubr.msk.bf16.gmra.mrb[60].mxu0 %vm1238_vm0, %v6893_v35  ;;  %v1174_v41 = vrot.slane %v1172_v29, 7  ;;  %v1304_v43 = vrot.slane %v1175_v32, 1  ;;  %v968_v44 = vadd.f32 %v6643_v11, %v926_v34  ;;  %v1003_v52 = vmax.f32 %v967_v33, 0.0  ;;  %v7019_v33 = vld [vmem:[#allocation2 + $0x130] sm:$0xff] }
 0x1dc   : > { %v1184_v46 = vor.u32 %v1182_v25, %v1181_v36  ;;  %v1307_v48 = vor.u32 %v1306_v39, %v1179_v24  ;;  %v5961_v24 = vld [vmem:[#allocation9 + $0x28] sm:$0xff]   ;;  %v7035_v39 = vld [vmem:[#allocation2 + $0x140] sm:$0xff] }
 0x1dd   : > { %v1177_v10 = vor.u32 %v1175_v32, %v1174_v41  ;;  %v1305_v50 = vor.u32 %v1304_v43, %v1172_v29  ;;  %v1004_v53 = vmax.f32 %v968_v44, 0.0  ;;  %v6962_v29 = vld [vmem:[#allocation2 + $0x20] sm:$0xff]  ;;  %v1854_v32 = vld [vmem:[#allocation2 + $0x128] sm:$0xff]  ;;  %v7031_v36 = vld [vmem:[#allocation2 + $0x138] sm:$0xff] }
 0x1de   : > { %v1235_v54 = vsel %vm6624_vm3, 0, %v1184_v46  ;;  %v1348_v57 = vsel %vm6652_vm6, %v1307_v48, 0  ;;  %v6916_v0 = vld [vmem:[#allocation2 + $0x68] sm:$0xff]  ;;  %v7047_v41 = vld [vmem:[#allocation2 + $0x150] sm:$0xff]  ;;  %v5964_v43 = vld [vmem:[#allocation9 + $0x70] sm:$0xff]  }
 0x1df   : > { %1254 = vst.msk [vmem:[#allocation2 + $0x78] sm:$0xff] %vm1238_vm0, %v1235_v54  ;;  %1367 = vst.msk [vmem:[#allocation2 + $0x198] sm:$0xff] %vm1238_vm0, %v1348_v57  ;;  %v1234_v59 = vsel %vm6624_vm3, 0, %v1177_v10  ;;  %v1347_v11 = vsel %vm6652_vm6, %v1305_v50, 0  ;;  %v1071_v60 = vpack.c.bf16 %v1004_v53, %v1003_v52  ;;  %v6908_v4 = vld [vmem:[#allocation2 + $0x60] sm:$0xff]  ;;  %v7055_v44 = vld [vmem:[#allocation2 + $0x158] sm:$0xff] }
 0x1e0   : > { %1253 = vst.msk [vmem:[#allocation2 + $0x70] sm:$0xff] %vm1238_vm0, %v1234_v59  ;;  %1366 = vst.msk [vmem:[#allocation2 + $0x190] sm:$0xff] %vm1238_vm0, %v1347_v11  ;;  %5364 = vmatmul.mubr.msk.bf16.gmra.mrb[12].mxu1 %vm1238_vm0, %v6908_v4  ;;  %v6914_v62 = vld [vmem:[#allocation2 + $0x100] sm:$0xff]  ;;  %v6923_v12 = vld [vmem:[#allocation2 + $0x108] sm:$0xff] }
 0x1e1   : > { %v1186_v5 = vshrl.u32 %v1071_v60, 16  ;;  %v1189_v6 = vshll.u32 %v1071_v60, 16  ;;  %1274 = vst.msk [vmem:[#allocation2 + $0x110] sm:$0xff] %vm1238_vm0, %v1071_v60  ;;  %5263 = vmatprep.mubr.msk.bf16.mxu0 %vm1238_vm0, %v6914_v62  ;;  %5367 = vmatprep.mubr.msk.bf16.mxu1 %vm1238_vm0, %v6916_v0  ;;  %v7059_v46 = vld [vmem:[#allocation2 + $0x160] sm:$0xff]  ;;  %v7067_v48 = vld [vmem:[#allocation2 + $0x168] sm:$0xff]  ;;  %v7071_v10 = vld [vmem:[#allocation2 + $0x170] sm:$0xff] }
 0x1e2   : > { %v7079_v50 = vld [vmem:[#allocation2 + $0x178] sm:$0xff]  ;;  %v7083_v52 = vld [vmem:[#allocation2 + $0x180] sm:$0xff]  ;;  %v7091_v53 = vld [vmem:[#allocation2 + $0x188] sm:$0xff] }
 0x1e3   : > { %5264 = vmatmul.mubr.msk.bf16.gmra.mrb[64].mxu0 %vm1238_vm0, %v6923_v12  ;;  %v1188_v13 = vrot.slane %v1186_v5, 7  ;;  %v1308_v15 = vrot.slane %v1189_v6, 1  ;;  %v5965_v11 = vld [vmem:[#allocation9 + $0x78] sm:$0xff]   ;;  %v5966_v60 = vld [vmem:[#allocation9 + $0x80] sm:$0xff]  }
 0x1e4   : > { %5271 = vmatprep.mubr.msk.bf16.mxu0 %vm1238_vm0, %v1370_v1 }
 0x1e5   : > { %v1191_v16 = vor.u32 %v1189_v6, %v1188_v13  ;;  %v1309_v17 = vor.u32 %v1308_v15, %v1186_v5 }
 0x1e6   : > { %v6938_v21 = vld [vmem:[#allocation2 + $0x78] sm:$0xff] }
 0x1e7   : > { %v1236_v18 = vsel %vm6624_vm3, 0, %v1191_v16  ;;  %v1349_v19 = vsel %vm6652_vm6, %v1309_v17, 0  ;;  %v6932_v20 = vld [vmem:[#allocation2 + $0x70] sm:$0xff]  ;;  %v7103_v57 = vld [vmem:[#allocation2 + $0x198] sm:$0xff] }
 0x1e8   : > { %1255 = vst.msk [vmem:[#allocation2 + $0x80] sm:$0xff] %vm1238_vm0, %v1236_v18  ;;  %1368 = vst.msk [vmem:[#allocation2 + $0x1a0] sm:$0xff] %vm1238_vm0, %v1349_v19  ;;  %5368 = vmatmul.mubr.msk.bf16.gmra.mrb[16].mxu1 %vm1238_vm0, %v6932_v20  ;;  %v7025_v34 = vld [vmem:[#allocation2 + $0x110] sm:$0xff] }
 0x1e9   : > { %5371 = vmatprep.mubr.msk.bf16.mxu1 %vm1238_vm0, %v6938_v21  ;;  %v7095_v54 = vld [vmem:[#allocation2 + $0x190] sm:$0xff] }
 0x1eb   : > { %5272 = vmatmul.mubr.msk.bf16.vlgmr.msra.gmra.mrb[36].mxu0 %vm1238_vm0, %v6942_v7 }
 0x1ec   : > { %5275 = vmatprep.mubr.msk.bf16.mxu0 %vm1238_vm0, %v6946_v31  ;;  %5304 = vmatpush3.bf16.msra.mxu0 %v6686_v14  ;;  %v5959_v14 = vld [vmem:[#allocation9 + $0x58] sm:$0xff]  }
 0x1ed   : > { %5305 = vmatprep.subr.bf16.mxu0 %v5961_v24 }
 0x1ef   : > { %v6951_v25 = vld [vmem:[#allocation2 + $0x80] sm:$0xff] }
 0x1f0   : > { %5306 = vmatpush3.bf16.msra.mxu0 %v5961_v24  ;;  %5372 = vmatmul.mubr.msk.bf16.gmra.mrb[20].mxu1 %vm1238_vm0, %v6951_v25  ;;  %v7117_v59 = vld [vmem:[#allocation2 + $0x1a0] sm:$0xff] }
 0x1f1   : > { %5339 = vmatprep.subr.bf16.mxu0 %v6613_v2  ;;  %5379 = vmatprep.mubr.msk.bf16.mxu1 %vm1238_vm0, %v6674_v58  ;;  %v5962_v58 = vld [vmem:[#allocation9 + $0x60] sm:$0xff]  }
 0x1f3   : > { %5276 = vmatmul.mubr.msk.bf16.gmra.mrb[40].mxu0 %vm1238_vm0, %v6958_v8 }
 0x1f4   : > { %5279 = vmatprep.mubr.msk.bf16.mxu0 %vm1238_vm0, %v6962_v29 }
 0x1f8   : > { %5380 = vmatmul.mubr.msk.bf16.vlgmr.msra.gmra.mrb[24].mxu1 %vm1238_vm0, %v6707_v42 }
 0x1f9   : > { %5412 = vmatpush3.bf16.msra.mxu1 %v6822_v61  ;;  %5383 = vmatprep.mubr.msk.bf16.mxu1 %vm1238_vm0, %v6714_v47  ;;  %v1853_v61 = vld [vmem:[#allocation2 + $0x120] sm:$0xff] }
 0x1fa   : > { %5413 = vmatprep.subr.bf16.mxu1 %v5959_v14 }
 0x1fb   : > { %5280 = vmatmul.mubr.msk.bf16.gmra.mrb[44].mxu0 %vm1238_vm0, %v6755_v51 }
 0x1fc   : > { %5283 = vmatprep.mubr.msk.bf16.mxu0 %vm1238_vm0, %v6796_v40 }
 0x1fd   : > { %5414 = vmatpush3.bf16.msra.mxu1 %v5959_v14 }
 0x1fe   : > { %5447 = vmatprep.subr.bf16.mxu1 %v5962_v58 }
 0x200   : > { %5384 = vmatmul.mubr.msk.bf16.gmra.mrb[28].mxu1 %vm1238_vm0, %v6737_v23 }
 0x201   : > { %5387 = vmatprep.mubr.msk.bf16.mxu1 %vm1238_vm0, %v6744_v27 }
 0x203   : > { %5284 = vmatmul.mubr.msk.bf16.gmra.mrb[48].mxu0 %vm1238_vm0, %v6813_v55 }
 0x204   : > { %5287 = vmatprep.mubr.msk.bf16.mxu0 %vm1238_vm0, %v6838_v30 }
 0x208   : > { %5388 = vmatmul.mubr.msk.bf16.gmra.mrb[0].mxu1 %vm1238_vm0, %v6771_v63 }
 0x209   : > { %5391 = vmatprep.mubr.msk.bf16.mxu1 %vm1238_vm0, %v6778_v9 }
 0x20b   : > { %5288 = vmatmul.mubr.msk.bf16.gmra.mrb[52].mxu0 %vm1238_vm0, %v6849_v38 }
 0x20c   : > { %5291 = vmatprep.mubr.msk.bf16.mxu0 %vm1238_vm0, %v6875_v22 }
 0x210   : > { %5392 = vmatmul.mubr.msk.bf16.gmra.mrb[4].mxu1 %vm1238_vm0, %v6805_v49 }
 0x211   : > { %5395 = vmatprep.mubr.msk.bf16.mxu1 %vm1238_vm0, %v6815_v56 }
 0x213   : > { %5292 = vmatmul.mubr.msk.bf16.gmra.mrb[56].mxu0 %vm1238_vm0, %v6884_v28 }
 0x214   : > { %5295 = vmatprep.mubr.msk.bf16.mxu0 %vm1238_vm0, %v6908_v4 }
 0x218   : > { %5396 = vmatmul.mubr.msk.bf16.gmra.mrb[8].mxu1 %vm1238_vm0, %v6847_v37 }
 0x219   : > { %5399 = vmatprep.mubr.msk.bf16.mxu1 %vm1238_vm0, %v6858_v45 }
 0x21b   : > { %5296 = vmatmul.mubr.msk.bf16.gmra.mrb[60].mxu0 %vm1238_vm0, %v6916_v0 }
 0x21c   : > { %5299 = vmatprep.mubr.msk.bf16.mxu0 %vm1238_vm0, %v6932_v20 }
 0x220   : > { %5400 = vmatmul.mubr.msk.bf16.gmra.mrb[12].mxu1 %vm1238_vm0, %v6882_v26 }
 0x221   : > { %5403 = vmatprep.mubr.msk.bf16.mxu1 %vm1238_vm0, %v6893_v35 }
 0x223   : > { %5300 = vmatmul.mubr.msk.bf16.gmra.mrb[64].mxu0 %vm1238_vm0, %v6938_v21 }
 0x224   : > { %5307 = vmatprep.mubr.msk.bf16.mxu0 %vm1238_vm0, %v1853_v61  ;;  %v7278_v61 = vld [vmem:[%s7644_s26] ss:$0 sm:$0xff] }
 0x228   : > { %5404 = vmatmul.mubr.msk.bf16.gmra.mrb[16].mxu1 %vm1238_vm0, %v6914_v62 }
 0x229   : > { %5407 = vmatprep.mubr.msk.bf16.mxu1 %vm1238_vm0, %v6923_v12 }
 0x22b   : > { %5308 = vmatmul.mubr.msk.bf16.vlgmr.msra.gmra.mrb[36].mxu0 %vm1238_vm0, %v1854_v32 }
 0x22c   : > { %5311 = vmatprep.mubr.msk.bf16.mxu0 %vm1238_vm0, %v7019_v33  ;;  %5340 = vmatpush3.bf16.msra.mxu0 %v6613_v2  ;;  %v5963_v2 = vld [vmem:[#allocation9 + $0x68] sm:$0xff]  }
 0x22d   : > { %5341 = vmatprep.subr.bf16.mxu0 %v6617_v3 }
 0x230   : > { %5342 = vmatpush3.bf16.msra.mxu0 %v6617_v3  ;;  %5408 = vmatmul.mubr.msk.bf16.gmra.mrb[20].mxu1 %vm1238_vm0, %v7025_v34  ;;  %v7043_v3 = vld [vmem:[#allocation2 + $0x148] sm:$0xff] }
 0x231   : > { %5415 = vmatprep.mubr.msk.bf16.mxu1 %vm1238_vm0, %v1854_v32 }
 0x233   : > { %5312 = vmatmul.mubr.msk.bf16.gmra.mrb[40].mxu0 %vm1238_vm0, %v7031_v36 }
 0x234   : > { %5315 = vmatprep.mubr.msk.bf16.mxu0 %vm1238_vm0, %v7035_v39 }
 0x238   : > { %5416 = vmatmul.mubr.msk.bf16.vlgmr.msra.gmra.mrb[24].mxu1 %vm1238_vm0, %v7019_v33 }
 0x239   : > { %5448 = vmatpush3.bf16.msra.mxu1 %v5962_v58  ;;  %5419 = vmatprep.mubr.msk.bf16.mxu1 %vm1238_vm0, %v7031_v36 }
 0x23a   : > { %5449 = vmatprep.subr.bf16.mxu1 %v5963_v2 }
 0x23b   : > { %5316 = vmatmul.mubr.msk.bf16.gmra.mrb[44].mxu0 %vm1238_vm0, %v7043_v3 }
 0x23c   : > { %5319 = vmatprep.mubr.msk.bf16.mxu0 %vm1238_vm0, %v7047_v41 }
 0x23d   : > { %5450 = vmatpush3.bf16.msra.mxu1 %v5963_v2 }
 0x23e   : > { %5483 = vmatprep.subr.bf16.mxu1 %v5964_v43 }
 0x240   : > { %5420 = vmatmul.mubr.msk.bf16.gmra.mrb[28].mxu1 %vm1238_vm0, %v7035_v39 }
 0x241   : > { %5423 = vmatprep.mubr.msk.bf16.mxu1 %vm1238_vm0, %v7043_v3 }
 0x243   : > { %5320 = vmatmul.mubr.msk.bf16.gmra.mrb[48].mxu0 %vm1238_vm0, %v7055_v44 }
 0x244   : > { %5323 = vmatprep.mubr.msk.bf16.mxu0 %vm1238_vm0, %v7059_v46 }
 0x248   : > { %5424 = vmatmul.mubr.msk.bf16.gmra.mrb[0].mxu1 %vm1238_vm0, %v7047_v41 }
 0x249   : > { %5427 = vmatprep.mubr.msk.bf16.mxu1 %vm1238_vm0, %v7055_v44 }
 0x24b   : > { %5324 = vmatmul.mubr.msk.bf16.gmra.mrb[52].mxu0 %vm1238_vm0, %v7067_v48 }
 0x24c   : > { %5327 = vmatprep.mubr.msk.bf16.mxu0 %vm1238_vm0, %v7071_v10 }
 0x250   : > { %5428 = vmatmul.mubr.msk.bf16.gmra.mrb[4].mxu1 %vm1238_vm0, %v7059_v46 }
 0x251   : > { %5431 = vmatprep.mubr.msk.bf16.mxu1 %vm1238_vm0, %v7067_v48 }
 0x253   : > { %5328 = vmatmul.mubr.msk.bf16.gmra.mrb[56].mxu0 %vm1238_vm0, %v7079_v50 }
 0x254   : > { %5331 = vmatprep.mubr.msk.bf16.mxu0 %vm1238_vm0, %v7083_v52 }
 0x258   : > { %5432 = vmatmul.mubr.msk.bf16.gmra.mrb[8].mxu1 %vm1238_vm0, %v7071_v10 }
 0x259   : > { %5435 = vmatprep.mubr.msk.bf16.mxu1 %vm1238_vm0, %v7079_v50 }
 0x25b   : > { %5332 = vmatmul.mubr.msk.bf16.gmra.mrb[60].mxu0 %vm1238_vm0, %v7091_v53 }
 0x25c   : > { %5335 = vmatprep.mubr.msk.bf16.mxu0 %vm1238_vm0, %v7095_v54 }
 0x260   : > { %5436 = vmatmul.mubr.msk.bf16.gmra.mrb[12].mxu1 %vm1238_vm0, %v7083_v52 }
 0x261   : > { %5439 = vmatprep.mubr.msk.bf16.mxu1 %vm1238_vm0, %v7091_v53 }
 0x263   : > { %5336 = vmatmul.mubr.msk.bf16.gmra.mrb[64].mxu0 %vm1238_vm0, %v7103_v57 }
 0x264   : > { %5343 = vmatprep.mubr.msk.bf16.mxu0 %vm1238_vm0, %v6942_v7 }
 0x268   : > { %5440 = vmatmul.mubr.msk.bf16.gmra.mrb[16].mxu1 %vm1238_vm0, %v7095_v54 }
 0x269   : > { %5443 = vmatprep.mubr.msk.bf16.mxu1 %vm1238_vm0, %v7103_v57 }
 0x26b   : > { %5344 = vmatmul.mubr.msk.bf16.vlgmr.msra.gmra.mrb[36].mxu0 %vm1238_vm0, %v6946_v31 }
 0x26c   : > { %5347 = vmatprep.mubr.msk.bf16.mxu0 %vm1238_vm0, %v6958_v8 }
 0x270   : > { %5444 = vmatmul.mubr.msk.bf16.gmra.mrb[20].mxu1 %vm1238_vm0, %v7117_v59 }
 0x271   : > { %5451 = vmatprep.mubr.msk.bf16.mxu1 %vm1238_vm0, %v6946_v31 }
 0x273   : > { %5348 = vmatmul.mubr.msk.bf16.gmra.mrb[40].mxu0 %vm1238_vm0, %v6962_v29 }
 0x278   : > { %5452 = vmatmul.mubr.msk.bf16.vlgmr.msra.gmra.mrb[24].mxu1 %vm1238_vm0, %v6958_v8  ;;  %v7273_v8 = vld [vmem:[%s7643_s30] ss:$0 sm:$0xff]  ;;  %s6222_s30 = smov [#allocation11]  }
 0x279   : > { %5484 = vmatpush3.bf16.msra.mxu1 %v5964_v43  ;;  %5455 = vmatprep.mubr.msk.bf16.mxu1 %vm1238_vm0, %v6962_v29  ;;  %s6124_s28 = sshll.u32 %s6222_s30, 4  ;;  %s6125_s28 = int_to_ptr.vmem [resolvable:$false] %s6124_s28 }
 0x27a   : > { %5485 = vmatprep.subr.bf16.mxu1 %v5965_v11  ;;  %s6126_s19 = scalar_lea.vmem %s6125_s28, 4096  ;;  %p6127_p9 = scmp.lt.s32.totalorder %s7514_s16, %s6125_s28 }
 0x27b   : > { %p6128_p6 = scmp.lt.s32.totalorder %s6126_s19, %s6120_s27 }
 0x27d   : > { %5486 = vmatpush3.bf16.msra.mxu1 %v5965_v11  ;;  %p6129_p8 = por %p6128_p6, %p6127_p9 }
 0x27e   : > { %5519 = vmatprep.subr.bf16.mxu1 %v5966_v60 }
 0x27f   : > { %p6130_p12 = pnand %p6129_p8, %p6123_p3 }
 0x280   : > { %5456 = vmatmul.mubr.msk.bf16.gmra.mrb[28].mxu1 %vm1238_vm0, %v6755_v51  ;;  %v2968_v51 = vld [vmem:[#allocation2 + $0x88] sm:$0xff] }
 0x281   : > { %5459 = vmatprep.mubr.msk.bf16.mxu1 %vm1238_vm0, %v6796_v40  ;;  %v5967_v40 = vld [vmem:[#allocation9 + $0x88] sm:$0xff]  }
 0x288   : > { %5460 = vmatmul.mubr.msk.bf16.gmra.mrb[0].mxu1 %vm1238_vm0, %v6813_v55 }
 0x289   : > { %5463 = vmatprep.mubr.msk.bf16.mxu1 %vm1238_vm0, %v6838_v30 }
 0x290   : > { %5464 = vmatmul.mubr.msk.bf16.gmra.mrb[4].mxu1 %vm1238_vm0, %v6849_v38 }
 0x291   : > { %5467 = vmatprep.mubr.msk.bf16.mxu1 %vm1238_vm0, %v6875_v22 }
 0x298   : > { %5468 = vmatmul.mubr.msk.bf16.gmra.mrb[8].mxu1 %vm1238_vm0, %v6884_v28 }
 0x299   : > { %5471 = vmatprep.mubr.msk.bf16.mxu1 %vm1238_vm0, %v6908_v4 }
 0x2a0   : > { %5472 = vmatmul.mubr.msk.bf16.gmra.mrb[12].mxu1 %vm1238_vm0, %v6916_v0  ;;  %v3518_v0 = vld [vmem:[#allocation2 + $0x1a8] sm:$0xff] }
 0x2a1   : > { %5475 = vmatprep.mubr.msk.bf16.mxu1 %vm1238_vm0, %v6932_v20 }
 0x2a8   : > { %5476 = vmatmul.mubr.msk.bf16.gmra.mrb[16].mxu1 %vm1238_vm0, %v6938_v21 }
 0x2a9   : > { %5479 = vmatprep.mubr.msk.bf16.mxu1 %vm1238_vm0, %v6951_v25  ;;  %v5969_v25 = vld [vmem:[%s7642_s8 + $0x8] sm:$0xff]  }
 0x2b0   : > { %5480 = vmatmul.mubr.msk.bf16.gmra.mrb[20].mxu1 %vm1238_vm0, %v2968_v51 }
 0x2b1   : > { %5487 = vmatprep.mubr.msk.bf16.mxu1 %vm1238_vm0, %v6707_v42  ;;  %v5968_v42 = vld [vmem:[%s7642_s8] sm:$0xff]  }
 0x2b2   : > { %5555 = vmatprep.subr.bf16.mxu0 %v5968_v42 }
 0x2b3   : > { %5556 = vmatpush3.bf16.msra.mxu0 %v5968_v42 }
 0x2b4   : > { %5557 = vmatprep.subr.bf16.mxu0 %v5969_v25 }
 0x2b7   : > { %5558 = vmatpush3.bf16.msra.mxu0 %v5969_v25 }
 0x2b8   : > { %5488 = vmatmul.mubr.msk.bf16.vlgmr.msra.gmra.mrb[24].mxu1 %vm1238_vm0, %v6714_v47  ;;  %v3243_v47 = vld [vmem:[#allocation2 + $0x118] sm:$0xff] }
 0x2b9   : > { %5520 = vmatpush3.bf16.msra.mxu1 %v5966_v60  ;;  %5491 = vmatprep.mubr.msk.bf16.mxu1 %vm1238_vm0, %v6737_v23 }
 0x2ba   : > { %5521 = vmatprep.subr.bf16.mxu1 %v5967_v40 }
 0x2bd   : > { %5522 = vmatpush3.bf16.msra.mxu1 %v5967_v40 }
 0x2c0   : > { %5492 = vmatmul.mubr.msk.bf16.gmra.mrb[28].mxu1 %vm1238_vm0, %v6744_v27 }
 0x2c1   : > { %5495 = vmatprep.mubr.msk.bf16.mxu1 %vm1238_vm0, %v6771_v63 }
 0x2c8   : > { %5496 = vmatmul.mubr.msk.bf16.gmra.mrb[0].mxu1 %vm1238_vm0, %v6778_v9 }
 0x2c9   : > { %5499 = vmatprep.mubr.msk.bf16.mxu1 %vm1238_vm0, %v6805_v49 }
 0x2d0   : > { %5500 = vmatmul.mubr.msk.bf16.gmra.mrb[4].mxu1 %vm1238_vm0, %v6815_v56 }
 0x2d1   : > { %5503 = vmatprep.mubr.msk.bf16.mxu1 %vm1238_vm0, %v6847_v37 }
 0x2d8   : > { %5504 = vmatmul.mubr.msk.bf16.gmra.mrb[8].mxu1 %vm1238_vm0, %v6858_v45 }
 0x2d9   : > { %5507 = vmatprep.mubr.msk.bf16.mxu1 %vm1238_vm0, %v6882_v26 }
 0x2e0   : > { %5508 = vmatmul.mubr.msk.bf16.gmra.mrb[12].mxu1 %vm1238_vm0, %v6893_v35 }
 0x2e1   : > { %5511 = vmatprep.mubr.msk.bf16.mxu1 %vm1238_vm0, %v6914_v62 }
 0x2e8   : > { %5512 = vmatmul.mubr.msk.bf16.gmra.mrb[16].mxu1 %vm1238_vm0, %v6923_v12 }
 0x2e9   : > { %5515 = vmatprep.mubr.msk.bf16.mxu1 %vm1238_vm0, %v7025_v34 }
 0x2f0   : > { %5516 = vmatmul.mubr.msk.bf16.gmra.mrb[20].mxu1 %vm1238_vm0, %v3243_v47 }
 0x2f1   : > { %5523 = vmatprep.mubr.msk.bf16.mxu1 %vm1238_vm0, %v7019_v33 }
 0x2f8   : > { %5524 = vmatmul.mubr.msk.bf16.vlgmr.msra.gmra.mrb[24].mxu1 %vm1238_vm0, %v7031_v36 }
 0x2f9   : > { %5527 = vmatprep.mubr.msk.bf16.mxu1 %vm1238_vm0, %v7035_v39 }
 0x300   : > { %5528 = vmatmul.mubr.msk.bf16.gmra.mrb[28].mxu1 %vm1238_vm0, %v7043_v3 }
 0x301   : > { %5531 = vmatprep.mubr.msk.bf16.mxu1 %vm1238_vm0, %v7047_v41 }
 0x308   : > { %5532 = vmatmul.mubr.msk.bf16.gmra.mrb[0].mxu1 %vm1238_vm0, %v7055_v44 }
 0x309   : > { %5535 = vmatprep.mubr.msk.bf16.mxu1 %vm1238_vm0, %v7059_v46 }
 0x30e   : > { %v7202_v23 = vpop.f32.mrb[44].mxu0 }
 0x30f   : > { %v7204_v27 = vpop.f32.mrb[45].mxu0 }
 0x310   : > { %v7206_v63 = vpop.f32.mrb[46].mxu0  ;;  %5536 = vmatmul.mubr.msk.bf16.gmra.mrb[4].mxu1 %vm1238_vm0, %v7067_v48 }
 0x311   : > { %v7208_v9 = vpop.f32.mrb[47].mxu0  ;;  %5539 = vmatprep.mubr.msk.bf16.mxu1 %vm1238_vm0, %v7071_v10 }
 0x316   : > { %v7214_v49 = vpop.f32.mrb[48].mxu0 }
 0x317   : > { %v7216_v55 = vpop.f32.mrb[49].mxu0 }
 0x318   : > { %v7218_v56 = vpop.f32.mrb[50].mxu0  ;;  %5540 = vmatmul.mubr.msk.bf16.gmra.mrb[8].mxu1 %vm1238_vm0, %v7079_v50 }
 0x319   : > { %v7220_v30 = vpop.f32.mrb[51].mxu0  ;;  %5543 = vmatprep.mubr.msk.bf16.mxu1 %vm1238_vm0, %v7083_v52 }
 0x31e   : > { %v7226_v37 = vpop.f32.mrb[52].mxu0 }
 0x31f   : > { %v7228_v38 = vpop.f32.mrb[53].mxu0 }
 0x320   : > { %v7230_v45 = vpop.f32.mrb[54].mxu0  ;;  %5544 = vmatmul.mubr.msk.bf16.gmra.mrb[12].mxu1 %vm1238_vm0, %v7091_v53 }
 0x321   : > { %v7232_v22 = vpop.f32.mrb[55].mxu0  ;;  %5547 = vmatprep.mubr.msk.bf16.mxu1 %vm1238_vm0, %v7095_v54 }
 0x326   : > { %v7238_v26 = vpop.f32.mrb[56].mxu0 }
 0x327   : > { %v7240_v28 = vpop.f32.mrb[57].mxu0 }
 0x328   : > { %v7242_v35 = vpop.f32.mrb[58].mxu0  ;;  %5548 = vmatmul.mubr.msk.bf16.gmra.mrb[16].mxu1 %vm1238_vm0, %v7103_v57 }
 0x329   : > { %v7244_v4 = vpop.f32.mrb[59].mxu0  ;;  %5551 = vmatprep.mubr.msk.bf16.mxu1 %vm1238_vm0, %v7117_v59 }
 0x32e   : > { %v7250_v62 = vpop.f32.mrb[60].mxu0 }
 0x32f   : > { %v7252_v1 = vpop.f32.mrb[61].mxu0 }
 0x330   : > { %v7254_v5 = vpop.f32.mrb[62].mxu0  ;;  %5552 = vmatmul.mubr.msk.bf16.gmra.mrb[20].mxu1 %vm1238_vm0, %v3518_v0 }
 0x331   : > { %v7256_v6 = vpop.f32.mrb[63].mxu0 }
 0x336   : > { %v7259_v12 = vpop.f32.mrb[64].mxu0 }
 0x337   : > { %v7261_v13 = vpop.f32.mrb[65].mxu0 }
 0x338   : > { %v7263_v15 = vpop.f32.mrb[66].mxu0 }
 0x339   : > { %v7265_v16 = vpop.f32.mrb[67].mxu0 }
 0x33e   : > { %v5345_v17 = vpop.f32.mrb[36].mxu0 }
 0x33f   : > { %v2243_v18 = vpop.f32.mrb[37].mxu0 }
 0x340   : > { %v5346_v19 = vpop.f32.mrb[38].mxu0 }
 0x341   : > { %v2246_v20 = vpop.f32.mrb[39].mxu0 }
 0x346   : > { %v5349_v21 = vpop.f32.mrb[40].mxu0 }
 0x347   : > { %v2259_v24 = vpop.f32.mrb[41].mxu0 }
 0x348   : > { %v5350_v7 = vpop.f32.mrb[42].mxu0 }
 0x349   : > { %v2262_v31 = vpop.f32.mrb[43].mxu0 }
 0x3cb   : > { %v5525_v29 = vpop.f32.mrb[24].mxu1 }
 0x3cc   : > { %v5595_v14 = vadd.f32 %v5525_v29, %v5345_v17  ;;  %v3618_v58 = vpop.f32.mrb[25].mxu1 }
 0x3cd   : > { %v5596_v32 = vadd.f32 %v3618_v58, %v2243_v18  ;;  %v5526_v33 = vpop.f32.mrb[26].mxu1 }
 0x3ce   : > { %v3785_v34 = vmul.f32 %v5595_v14, %v7273_v8  ;;  %v5597_v36 = vadd.f32 %v5526_v33, %v5346_v19  ;;  %v3621_v39 = vpop.f32.mrb[27].mxu1 }
 0x3cf   : > { %v3783_v2 = vmul.f32 %v5596_v32, %v7273_v8  ;;  %v5598_v3 = vadd.f32 %v3621_v39, %v2246_v20 }
 0x3d0   : > { %v3823_v41 = vadd.f32 %v7278_v61, %v3785_v34  ;;  %v3786_v43 = vmul.f32 %v5597_v36, %v7273_v8 }
 0x3d1   : > { %v3821_v44 = vadd.f32 %v7278_v61, %v3783_v2  ;;  %v3784_v46 = vmul.f32 %v5598_v3, %v7273_v8 }
 0x3d2   : > { %v3824_v48 = vadd.f32 %v7278_v61, %v3786_v43  ;;  %v3855_v52 = vmax.f32 %v3823_v41, 0.0 }
 0x3d3   : > { %v3822_v10 = vadd.f32 %v7278_v61, %v3784_v46  ;;  %v5529_v50 = vpop.f32.mrb[28].mxu1  ;;  %v3853_v59 = vmax.f32 %v3821_v44, 0.0 }
 0x3d4   : > { %v3856_v53 = vmax.f32 %v3824_v48, 0.0  ;;  %v5599_v54 = vadd.f32 %v5529_v50, %v5349_v21  ;;  %v3634_v57 = vpop.f32.mrb[29].mxu1 }
 0x3d5   : > { %v3854_v11 = vmax.f32 %v3822_v10, 0.0  ;;  %v5600_v60 = vadd.f32 %v3634_v57, %v2259_v24  ;;  %v5530_v51 = vpop.f32.mrb[30].mxu1 }
 0x3d6   : > { %v3886_v40 = vpack.c.bf16 %v3856_v53, %v3855_v52  ;;  %v3789_v42 = vmul.f32 %v5599_v54, %v7273_v8  ;;  %v5601_v47 = vadd.f32 %v5530_v51, %v5350_v7  ;;  %v3637_v0 = vpop.f32.mrb[31].mxu1 }
 0x3d7   : > { %v3885_v17 = vpack.c.bf16 %v3854_v11, %v3853_v59  ;;  %v3787_v18 = vmul.f32 %v5600_v60, %v7273_v8  ;;  %v5602_v19 = vadd.f32 %v3637_v0, %v2262_v31 }
 0x3d8   : > { %v3827_v20 = vadd.f32 %v7278_v61, %v3789_v42  ;;  %v3790_v25 = vmul.f32 %v5601_v47, %v7273_v8 }
 0x3d9   : > { %v3825_v21 = vadd.f32 %v7278_v61, %v3787_v18  ;;  %v3788_v29 = vmul.f32 %v5602_v19, %v7273_v8  ;;  %5559 = vmatprep.mubr.msk.bf16.mxu0 %vm1238_vm0, %v3885_v17 }
 0x3da   : > { %v3828_v24 = vadd.f32 %v7278_v61, %v3790_v25  ;;  %5560 = vmatmul.mubr.msk.bf16.vlgmr.msra.gmra.mrb[68].mxu0 %vm1238_vm0, %v3886_v40  ;;  %v3859_v58 = vmax.f32 %v3827_v20, 0.0 }
 0x3db   : > { %v3826_v7 = vadd.f32 %v7278_v61, %v3788_v29  ;;  %v5533_v14 = vpop.f32.mrb[0].mxu1  ;;  %v3857_v34 = vmax.f32 %v3825_v21, 0.0 }
 0x3dc   : > { %v3860_v32 = vmax.f32 %v3828_v24, 0.0  ;;  %v5603_v31 = vadd.f32 %v5533_v14, %v7202_v23  ;;  %v3650_v33 = vpop.f32.mrb[1].mxu1 }
 0x3dd   : > { %v3858_v36 = vmax.f32 %v3826_v7, 0.0  ;;  %v5604_v39 = vadd.f32 %v3650_v33, %v7204_v27  ;;  %v5534_v2 = vpop.f32.mrb[2].mxu1 }
 0x3de   : > { %v3888_v3 = vpack.c.bf16 %v3860_v32, %v3859_v58  ;;  %v3793_v41 = vmul.f32 %v5603_v31, %v7273_v8  ;;  %v5605_v43 = vadd.f32 %v5534_v2, %v7206_v63  ;;  %v3653_v44 = vpop.f32.mrb[3].mxu1 }
 0x3df   : > { %v3887_v46 = vpack.c.bf16 %v3858_v36, %v3857_v34  ;;  %v3791_v48 = vmul.f32 %v5604_v39, %v7273_v8  ;;  %v5606_v10 = vadd.f32 %v3653_v44, %v7208_v9 }
 0x3e0   : > { %v3831_v50 = vadd.f32 %v7278_v61, %v3793_v41  ;;  %v3794_v23 = vmul.f32 %v5605_v43, %v7273_v8 }
 0x3e1   : > { %v3829_v52 = vadd.f32 %v7278_v61, %v3791_v48  ;;  %v3792_v27 = vmul.f32 %v5606_v10, %v7273_v8  ;;  %5563 = vmatprep.mubr.msk.bf16.mxu0 %vm1238_vm0, %v3887_v46 }
 0x3e2   : > { %v3832_v53 = vadd.f32 %v7278_v61, %v3794_v23  ;;  %5564 = vmatmul.mubr.msk.bf16.gmra.mrb[72].mxu0 %vm1238_vm0, %v3888_v3  ;;  %v3863_v57 = vmax.f32 %v3831_v50, 0.0 }
 0x3e3   : > { %v3830_v63 = vadd.f32 %v7278_v61, %v3792_v27  ;;  %v5537_v54 = vpop.f32.mrb[4].mxu1  ;;  %v3861_v60 = vmax.f32 %v3829_v52, 0.0 }
 0x3e4   : > { %v3864_v59 = vmax.f32 %v3832_v53, 0.0  ;;  %v5607_v9 = vadd.f32 %v5537_v54, %v7214_v49  ;;  %v3666_v11 = vpop.f32.mrb[5].mxu1 }
 0x3e5   : > { %v3862_v51 = vmax.f32 %v3830_v63, 0.0  ;;  %v5608_v40 = vadd.f32 %v3666_v11, %v7216_v55  ;;  %v5538_v42 = vpop.f32.mrb[6].mxu1 }
 0x3e6   : > { %v3890_v47 = vpack.c.bf16 %v3864_v59, %v3863_v57  ;;  %v3797_v0 = vmul.f32 %v5607_v9, %v7273_v8  ;;  %v5609_v17 = vadd.f32 %v5538_v42, %v7218_v56  ;;  %v3669_v18 = vpop.f32.mrb[7].mxu1 }
 0x3e7   : > { %v3889_v19 = vpack.c.bf16 %v3862_v51, %v3861_v60  ;;  %v3795_v20 = vmul.f32 %v5608_v40, %v7273_v8  ;;  %v5610_v25 = vadd.f32 %v3669_v18, %v7220_v30 }
 0x3e8   : > { %v3835_v21 = vadd.f32 %v7278_v61, %v3797_v0  ;;  %v3798_v49 = vmul.f32 %v5609_v17, %v7273_v8 }
 0x3e9   : > { %v3833_v29 = vadd.f32 %v7278_v61, %v3795_v20  ;;  %v3796_v55 = vmul.f32 %v5610_v25, %v7273_v8  ;;  %5567 = vmatprep.mubr.msk.bf16.mxu0 %vm1238_vm0, %v3889_v19 }
 0x3ea   : > { %v3836_v24 = vadd.f32 %v7278_v61, %v3798_v49  ;;  %5568 = vmatmul.mubr.msk.bf16.gmra.mrb[76].mxu0 %vm1238_vm0, %v3890_v47  ;;  %v3867_v14 = vmax.f32 %v3835_v21, 0.0 }
 0x3eb   : > { %v3834_v56 = vadd.f32 %v7278_v61, %v3796_v55  ;;  %v5541_v7 = vpop.f32.mrb[8].mxu1  ;;  %v3865_v31 = vmax.f32 %v3833_v29, 0.0 }
 0x3ec   : > { %v3868_v58 = vmax.f32 %v3836_v24, 0.0  ;;  %v5611_v30 = vadd.f32 %v5541_v7, %v7226_v37  ;;  %v3682_v32 = vpop.f32.mrb[9].mxu1 }
 0x3ed   : > { %v3866_v33 = vmax.f32 %v3834_v56, 0.0  ;;  %v5612_v34 = vadd.f32 %v3682_v32, %v7228_v38  ;;  %v5542_v36 = vpop.f32.mrb[10].mxu1 }
 0x3ee   : > { %v3892_v39 = vpack.c.bf16 %v3868_v58, %v3867_v14  ;;  %v3801_v2 = vmul.f32 %v5611_v30, %v7273_v8  ;;  %v5613_v3 = vadd.f32 %v5542_v36, %v7230_v45  ;;  %v3685_v41 = vpop.f32.mrb[11].mxu1 }
 0x3ef   : > { %v3891_v43 = vpack.c.bf16 %v3866_v33, %v3865_v31  ;;  %v3799_v44 = vmul.f32 %v5612_v34, %v7273_v8  ;;  %v5614_v46 = vadd.f32 %v3685_v41, %v7232_v22 }
 0x3f0   : > { %v3839_v48 = vadd.f32 %v7278_v61, %v3801_v2  ;;  %v3802_v37 = vmul.f32 %v5613_v3, %v7273_v8 }
 0x3f1   : > { %v3837_v10 = vadd.f32 %v7278_v61, %v3799_v44  ;;  %v3800_v38 = vmul.f32 %v5614_v46, %v7273_v8  ;;  %5571 = vmatprep.mubr.msk.bf16.mxu0 %vm1238_vm0, %v3891_v43 }
 0x3f2   : > { %v3840_v50 = vadd.f32 %v7278_v61, %v3802_v37  ;;  %5572 = vmatmul.mubr.msk.bf16.gmra.mrb[80].mxu0 %vm1238_vm0, %v3892_v39  ;;  %v3871_v52 = vmax.f32 %v3839_v48, 0.0 }
 0x3f3   : > { %v3838_v45 = vadd.f32 %v7278_v61, %v3800_v38  ;;  %v5545_v23 = vpop.f32.mrb[12].mxu1  ;;  %v3869_v63 = vmax.f32 %v3837_v10, 0.0 }
 0x3f4   : > { %v3872_v27 = vmax.f32 %v3840_v50, 0.0  ;;  %v5615_v22 = vadd.f32 %v5545_v23, %v7238_v26  ;;  %v3698_v53 = vpop.f32.mrb[13].mxu1 }
 0x3f5   : > { %v3870_v54 = vmax.f32 %v3838_v45, 0.0  ;;  %v5616_v57 = vadd.f32 %v3698_v53, %v7240_v28  ;;  %v5546_v59 = vpop.f32.mrb[14].mxu1 }
 0x3f6   : > { %v3894_v9 = vpack.c.bf16 %v3872_v27, %v3871_v52  ;;  %v3805_v11 = vmul.f32 %v5615_v22, %v7273_v8  ;;  %v5617_v60 = vadd.f32 %v5546_v59, %v7242_v35  ;;  %v3701_v51 = vpop.f32.mrb[15].mxu1 }
 0x3f7   : > { %v3893_v40 = vpack.c.bf16 %v3870_v54, %v3869_v63  ;;  %v3803_v42 = vmul.f32 %v5616_v57, %v7273_v8  ;;  %v5618_v47 = vadd.f32 %v3701_v51, %v7244_v4 }
 0x3f8   : > { %v3843_v0 = vadd.f32 %v7278_v61, %v3805_v11  ;;  %v3806_v26 = vmul.f32 %v5617_v60, %v7273_v8 }
 0x3f9   : > { %v3841_v17 = vadd.f32 %v7278_v61, %v3803_v42  ;;  %v3804_v28 = vmul.f32 %v5618_v47, %v7273_v8  ;;  %5575 = vmatprep.mubr.msk.bf16.mxu0 %vm1238_vm0, %v3893_v40 }
 0x3fa   : > { %v3844_v18 = vadd.f32 %v7278_v61, %v3806_v26  ;;  %5576 = vmatmul.mubr.msk.bf16.gmra.mrb[84].mxu0 %vm1238_vm0, %v3894_v9  ;;  %v3875_v20 = vmax.f32 %v3843_v0, 0.0 }
 0x3fb   : > { %v3842_v35 = vadd.f32 %v7278_v61, %v3804_v28  ;;  %v5549_v19 = vpop.f32.mrb[16].mxu1  ;;  %v3873_v49 = vmax.f32 %v3841_v17, 0.0 }
 0x3fc   : > { %v3876_v25 = vmax.f32 %v3844_v18, 0.0  ;;  %v5619_v4 = vadd.f32 %v5549_v19, %v7250_v62  ;;  %v3714_v21 = vpop.f32.mrb[17].mxu1  ;;  %v5970_v18 = vld [vmem:[%s6534_s11 + $0x10] sm:$0xff] }
 0x3fd   : > { %v3874_v29 = vmax.f32 %v3842_v35, 0.0  ;;  %v5620_v55 = vadd.f32 %v3714_v21, %v7252_v1  ;;  %v5550_v24 = vpop.f32.mrb[18].mxu1  ;;  %v5972_v21 = vld [vmem:[%s6534_s11 + $0x18] sm:$0xff] }
 0x3fe   : > { %v3896_v56 = vpack.c.bf16 %v3876_v25, %v3875_v20  ;;  %v3809_v7 = vmul.f32 %v5619_v4, %v7273_v8  ;;  %v5621_v14 = vadd.f32 %v5550_v24, %v7254_v5  ;;  %v3717_v58 = vpop.f32.mrb[19].mxu1  ;;  %v5971_v20 = vld [vmem:[%s6534_s11] sm:$0xff] }
 0x3ff   : > { %v3895_v30 = vpack.c.bf16 %v3874_v29, %v3873_v49  ;;  %v3807_v32 = vmul.f32 %v5620_v55, %v7273_v8  ;;  %v5622_v31 = vadd.f32 %v3717_v58, %v7256_v6  ;;  %v5973_v29 = vld [vmem:[%s6534_s11 + $0x8] sm:$0xff] }
 0x400   : > { %v3847_v33 = vadd.f32 %v7278_v61, %v3809_v7  ;;  %v3810_v62 = vmul.f32 %v5621_v14, %v7273_v8 }
 0x401   : > { %v3845_v34 = vadd.f32 %v7278_v61, %v3807_v32  ;;  %v3808_v1 = vmul.f32 %v5622_v31, %v7273_v8  ;;  %5579 = vmatprep.mubr.msk.bf16.mxu0 %vm1238_vm0, %v3895_v30 }
 0x402   : > { %v3848_v36 = vadd.f32 %v7278_v61, %v3810_v62  ;;  %5580 = vmatmul.mubr.msk.bf16.gmra.mrb[88].mxu0 %vm1238_vm0, %v3896_v56  ;;  %v3879_v2 = vmax.f32 %v3847_v33, 0.0 }
 0x403   : > { %v3846_v5 = vadd.f32 %v7278_v61, %v3808_v1  ;;  %v5553_v39 = vpop.f32.mrb[20].mxu1  ;;  %v3877_v43 = vmax.f32 %v3845_v34, 0.0 }
 0x404   : > { %v3880_v3 = vmax.f32 %v3848_v36, 0.0  ;;  %v5623_v6 = vadd.f32 %v5553_v39, %v7259_v12  ;;  %v3730_v41 = vpop.f32.mrb[21].mxu1 }
 0x405   : > { %v3878_v44 = vmax.f32 %v3846_v5, 0.0  ;;  %v5624_v46 = vadd.f32 %v3730_v41, %v7261_v13  ;;  %v5554_v48 = vpop.f32.mrb[22].mxu1 }
 0x406   : > { %v3898_v37 = vpack.c.bf16 %v3880_v3, %v3879_v2  ;;  %v3813_v10 = vmul.f32 %v5623_v6, %v7273_v8  ;;  %v5625_v38 = vadd.f32 %v5554_v48, %v7263_v15  ;;  %v3733_v50 = vpop.f32.mrb[23].mxu1  ;;  %v5974_v3 = vld [vmem:[%s6534_s11 + $0x30] sm:$0xff]  ;;  %v5976_v48 = vld [vmem:[%s6534_s11 + $0x38] sm:$0xff] }
 0x407   : > { %v3897_v45 = vpack.c.bf16 %v3878_v44, %v3877_v43  ;;  %v3811_v23 = vmul.f32 %v5624_v46, %v7273_v8  ;;  %v5626_v52 = vadd.f32 %v3733_v50, %v7265_v16  ;;  %v5975_v43 = vld [vmem:[%s6534_s11 + $0x20] sm:$0xff] }
 0x408   : > { %v3851_v27 = vadd.f32 %v7278_v61, %v3813_v10  ;;  %v3814_v12 = vmul.f32 %v5625_v38, %v7273_v8  ;;  %v5977_v10 = vld [vmem:[%s6534_s11 + $0x28] sm:$0xff] }
 0x409   : > { %v3849_v22 = vadd.f32 %v7278_v61, %v3811_v23  ;;  %v3812_v13 = vmul.f32 %v5626_v52, %v7273_v8  ;;  %5583 = vmatprep.mubr.msk.bf16.mxu0 %vm1238_vm0, %v3897_v45  ;;  %v7387_v8 = vld [vmem:[%s7645_s20] ss:$0 sm:$0xff] }
 0x40a   : > { %v3852_v53 = vadd.f32 %v7278_v61, %v3814_v12  ;;  %5584 = vmatmul.mubr.msk.bf16.gmra.mrb[92].mxu0 %vm1238_vm0, %v3898_v37  ;;  %v3883_v63 = vmax.f32 %v3851_v27, 0.0 }
 0x40b   : > { %v3850_v15 = vadd.f32 %v7278_v61, %v3812_v13  ;;  %v3881_v57 = vmax.f32 %v3849_v22, 0.0  ;;  %v7392_v61 = vld [vmem:[%s7646_s7] ss:$0 sm:$0xff] }
 0x40c   : > { %v3884_v54 = vmax.f32 %v3852_v53, 0.0 }
 0x40d   : > { %v3882_v16 = vmax.f32 %v3850_v15, 0.0 }
 0x40e   : > { %v3900_v59 = vpack.c.bf16 %v3884_v54, %v3883_v63 }
 0x40f   : > { %v3899_v9 = vpack.c.bf16 %v3882_v16, %v3881_v57 }
 0x411   : > { %5587 = vmatprep.mubr.msk.bf16.mxu0 %vm1238_vm0, %v3899_v9 }
 0x412   : > { %5588 = vmatmul.mubr.msk.bf16.gmra.mrb[96].mxu0 %vm1238_vm0, %v3900_v59 }
 0x4ad   : > { %v5561_v11 = vpop.f32.mrb[68].mxu0 }
 0x4ae   : > { %v4134_v60 = vmul.f32 %v5561_v11, %v7387_v8  ;;  %v3999_v51 = vpop.f32.mrb[69].mxu0  ;;  %v5978_v11 = vld [vmem:[%s6534_s11 + $0x50] sm:$0xff] }
 0x4af   : > { %v4132_v40 = vmul.f32 %v7387_v8, %v3999_v51  ;;  %v5562_v42 = vpop.f32.mrb[70].mxu0 }
 0x4b0   : > { %v4172_v47 = vadd.f32 %v7392_v61, %v4134_v60  ;;  %v4135_v0 = vmul.f32 %v5562_v42, %v7387_v8  ;;  %v4002_v26 = vpop.f32.mrb[71].mxu0 }
 0x4b1   : > { %v4170_v17 = vadd.f32 %v7392_v61, %v4132_v40  ;;  %v4133_v28 = vmul.f32 %v7387_v8, %v4002_v26  ;;  %v5979_v40 = vld [vmem:[%s6534_s11 + $0x40] sm:$0xff] }
 0x4b2   : > { %v4204_v35 = vadd.f32 %v5970_v18, %v4172_v47  ;;  %v4173_v19 = vadd.f32 %v7392_v61, %v4135_v0  ;;  %v5980_v0 = vld [vmem:[%s6534_s11 + $0x58] sm:$0xff] }
 0x4b3   : > { %v4202_v25 = vadd.f32 %v5971_v20, %v4170_v17  ;;  %v4171_v4 = vadd.f32 %v7392_v61, %v4133_v28  ;;  %v5981_v17 = vld [vmem:[%s6534_s11 + $0x48] sm:$0xff] }
 0x4b4   : > { %v4205_v49 = vadd.f32 %v5972_v21, %v4173_v19  ;;  %v4236_v56 = vmax.f32 %v4204_v35, 0.0 }
 0x4b5   : > { %v4203_v55 = vadd.f32 %v5973_v29, %v4171_v4  ;;  %v5565_v24 = vpop.f32.mrb[72].mxu0  ;;  %v4234_v30 = vmax.f32 %v4202_v25, 0.0 }
 0x4b6   : > { %v4237_v7 = vmax.f32 %v4205_v49, 0.0  ;;  %v4138_v14 = vmul.f32 %v5565_v24, %v7387_v8  ;;  %v4015_v58 = vpop.f32.mrb[73].mxu0 }
 0x4b7   : > { %v4235_v32 = vmax.f32 %v4203_v55, 0.0  ;;  %v4136_v31 = vmul.f32 %v7387_v8, %v4015_v58  ;;  %v5566_v33 = vpop.f32.mrb[74].mxu0 }
 0x4b8   : > { %v4885_v62 = vpack.c.bf16 %v4237_v7, %v4236_v56  ;;  %v4176_v34 = vadd.f32 %v7392_v61, %v4138_v14  ;;  %v4139_v1 = vmul.f32 %v5566_v33, %v7387_v8  ;;  %v4018_v36 = vpop.f32.mrb[75].mxu0 }
 0x4b9   : > { %v4880_v5 = vpack.c.bf16 %v4235_v32, %v4234_v30  ;;  %v4174_v39 = vadd.f32 %v7392_v61, %v4136_v31  ;;  %v4137_v2 = vmul.f32 %v7387_v8, %v4018_v36  ;;  %v5982_v32 = vld [vmem:[%s6534_s11 + $0x70] sm:$0xff]  ;;  %v5984_v36 = vld [vmem:[%s6534_s11 + $0x78] sm:$0xff] }
 0x4ba   : > { %4958 = vst [vmem:[%s7413_s10 + $0x8] sm:$0xff] %v4885_v62   ;;  %v4208_v6 = vadd.f32 %v5974_v3, %v4176_v34  ;;  %v4177_v41 = vadd.f32 %v7392_v61, %v4139_v1  ;;  %v5983_v62 = vld [vmem:[%s6534_s11 + $0x60] sm:$0xff] }
 0x4bb   : > { %4881 = vst [vmem:[%s7413_s10] sm:$0xff] %v4880_v5   ;;  %v4206_v44 = vadd.f32 %v5975_v43, %v4174_v39  ;;  %v4175_v46 = vadd.f32 %v7392_v61, %v4137_v2  ;;  %v5985_v39 = vld [vmem:[%s6534_s11 + $0x68] sm:$0xff] }
 0x4bc   : > { %v4209_v37 = vadd.f32 %v5976_v48, %v4177_v41  ;;  %v4240_v45 = vmax.f32 %v4208_v6, 0.0 }
 0x4bd   : > { %v4207_v38 = vadd.f32 %v5977_v10, %v4175_v46  ;;  %v5569_v50 = vpop.f32.mrb[76].mxu0  ;;  %v4238_v12 = vmax.f32 %v4206_v44, 0.0 }
 0x4be   : > { %v4241_v23 = vmax.f32 %v4209_v37, 0.0  ;;  %v4142_v52 = vmul.f32 %v5569_v50, %v7387_v8  ;;  %v4031_v27 = vpop.f32.mrb[77].mxu0 }
 0x4bf   : > { %v4239_v22 = vmax.f32 %v4207_v38, 0.0  ;;  %v4140_v13 = vmul.f32 %v7387_v8, %v4031_v27  ;;  %v5570_v53 = vpop.f32.mrb[78].mxu0 }
 0x4c0   : > { %v4895_v15 = vpack.c.bf16 %v4241_v23, %v4240_v45  ;;  %v4180_v63 = vadd.f32 %v7392_v61, %v4142_v52  ;;  %v4143_v54 = vmul.f32 %v5570_v53, %v7387_v8  ;;  %v4034_v57 = vpop.f32.mrb[79].mxu0 }
 0x4c1   : > { %v4890_v16 = vpack.c.bf16 %v4239_v22, %v4238_v12  ;;  %v4178_v59 = vadd.f32 %v7392_v61, %v4140_v13  ;;  %v4141_v9 = vmul.f32 %v7387_v8, %v4034_v57  ;;  %v5986_v22 = vld [vmem:[%s6534_s11 + $0x90] sm:$0xff]  ;;  %v5988_v57 = vld [vmem:[%s6534_s11 + $0x98] sm:$0xff] }
 0x4c2   : > { %4960 = vst [vmem:[%s7413_s10 + $0x18] sm:$0xff] %v4895_v15   ;;  %v4212_v60 = vadd.f32 %v5978_v11, %v4180_v63  ;;  %v4181_v51 = vadd.f32 %v7392_v61, %v4143_v54  ;;  %v5987_v15 = vld [vmem:[%s6534_s11 + $0x80] sm:$0xff] }
 0x4c3   : > { %4959 = vst [vmem:[%s7413_s10 + $0x10] sm:$0xff] %v4890_v16   ;;  %v4210_v42 = vadd.f32 %v5979_v40, %v4178_v59  ;;  %v4179_v47 = vadd.f32 %v7392_v61, %v4141_v9  ;;  %v5989_v59 = vld [vmem:[%s6534_s11 + $0x88] sm:$0xff] }
 0x4c4   : > { %v4213_v26 = vadd.f32 %v5980_v0, %v4181_v51  ;;  %v4244_v35 = vmax.f32 %v4212_v60, 0.0 }
 0x4c5   : > { %v4211_v28 = vadd.f32 %v5981_v17, %v4179_v47  ;;  %v5573_v18 = vpop.f32.mrb[80].mxu0  ;;  %v4242_v4 = vmax.f32 %v4210_v42, 0.0 }
 0x4c6   : > { %v4245_v19 = vmax.f32 %v4213_v26, 0.0  ;;  %v4146_v20 = vmul.f32 %v5573_v18, %v7387_v8  ;;  %v4047_v25 = vpop.f32.mrb[81].mxu0 }
 0x4c7   : > { %v4243_v21 = vmax.f32 %v4211_v28, 0.0  ;;  %v4144_v49 = vmul.f32 %v7387_v8, %v4047_v25  ;;  %v5574_v29 = vpop.f32.mrb[82].mxu0 }
 0x4c8   : > { %v4905_v55 = vpack.c.bf16 %v4245_v19, %v4244_v35  ;;  %v4184_v24 = vadd.f32 %v7392_v61, %v4146_v20  ;;  %v4147_v56 = vmul.f32 %v5574_v29, %v7387_v8  ;;  %v4050_v7 = vpop.f32.mrb[83].mxu0 }
 0x4c9   : > { %v4900_v14 = vpack.c.bf16 %v4243_v21, %v4242_v4  ;;  %v4182_v58 = vadd.f32 %v7392_v61, %v4144_v49  ;;  %v4145_v30 = vmul.f32 %v7387_v8, %v4050_v7  ;;  %v5990_v21 = vld [vmem:[%s6534_s11 + $0xb0] sm:$0xff]  ;;  %v5992_v7 = vld [vmem:[%s6534_s11 + $0xb8] sm:$0xff] }
 0x4ca   : > { %4962 = vst [vmem:[%s7413_s10 + $0x28] sm:$0xff] %v4905_v55   ;;  %v4216_v31 = vadd.f32 %v5982_v32, %v4184_v24  ;;  %v4185_v33 = vadd.f32 %v7392_v61, %v4147_v56  ;;  %v5991_v55 = vld [vmem:[%s6534_s11 + $0xa0] sm:$0xff] }
 0x4cb   : > { %4961 = vst [vmem:[%s7413_s10 + $0x20] sm:$0xff] %v4900_v14   ;;  %v4214_v34 = vadd.f32 %v5983_v62, %v4182_v58  ;;  %v4183_v1 = vadd.f32 %v7392_v61, %v4145_v30  ;;  %v5993_v58 = vld [vmem:[%s6534_s11 + $0xa8] sm:$0xff] }
 0x4cc   : > { %v4217_v5 = vadd.f32 %v5984_v36, %v4185_v33  ;;  %v4248_v6 = vmax.f32 %v4216_v31, 0.0 }
 0x4cd   : > { %v4215_v2 = vadd.f32 %v5985_v39, %v4183_v1  ;;  %v5577_v3 = vpop.f32.mrb[84].mxu0  ;;  %v4246_v46 = vmax.f32 %v4214_v34, 0.0 }
 0x4ce   : > { %v4249_v41 = vmax.f32 %v4217_v5, 0.0  ;;  %v4150_v43 = vmul.f32 %v5577_v3, %v7387_v8  ;;  %v4063_v44 = vpop.f32.mrb[85].mxu0 }
 0x4cf   : > { %v4247_v48 = vmax.f32 %v4215_v2, 0.0  ;;  %v4148_v37 = vmul.f32 %v7387_v8, %v4063_v44  ;;  %v5578_v10 = vpop.f32.mrb[86].mxu0 }
 0x4d0   : > { %v4915_v38 = vpack.c.bf16 %v4249_v41, %v4248_v6  ;;  %v4188_v50 = vadd.f32 %v7392_v61, %v4150_v43  ;;  %v4151_v45 = vmul.f32 %v5578_v10, %v7387_v8  ;;  %v4066_v23 = vpop.f32.mrb[87].mxu0 }
 0x4d1   : > { %v4910_v52 = vpack.c.bf16 %v4247_v48, %v4246_v46  ;;  %v4186_v27 = vadd.f32 %v7392_v61, %v4148_v37  ;;  %v4149_v12 = vmul.f32 %v7387_v8, %v4066_v23  ;;  %v5994_v48 = vld [vmem:[%s6534_s11 + $0xd0] sm:$0xff]  ;;  %v5996_v23 = vld [vmem:[%s6534_s11 + $0xd8] sm:$0xff] }
 0x4d2   : > { %4964 = vst [vmem:[%s7413_s10 + $0x38] sm:$0xff] %v4915_v38   ;;  %v4220_v13 = vadd.f32 %v5986_v22, %v4188_v50  ;;  %v4189_v53 = vadd.f32 %v7392_v61, %v4151_v45  ;;  %v5995_v38 = vld [vmem:[%s6534_s11 + $0xc0] sm:$0xff] }
 0x4d3   : > { %4963 = vst [vmem:[%s7413_s10 + $0x30] sm:$0xff] %v4910_v52   ;;  %v4218_v63 = vadd.f32 %v5987_v15, %v4186_v27  ;;  %v4187_v54 = vadd.f32 %v7392_v61, %v4149_v12  ;;  %v5997_v27 = vld [vmem:[%s6534_s11 + $0xc8] sm:$0xff] }
 0x4d4   : > { %v4221_v16 = vadd.f32 %v5988_v57, %v4189_v53  ;;  %v4252_v60 = vmax.f32 %v4220_v13, 0.0 }
 0x4d5   : > { %v4219_v9 = vadd.f32 %v5989_v59, %v4187_v54  ;;  %v5581_v11 = vpop.f32.mrb[88].mxu0  ;;  %v4250_v47 = vmax.f32 %v4218_v63, 0.0 }
 0x4d6   : > { %v4253_v51 = vmax.f32 %v4221_v16, 0.0  ;;  %v4154_v40 = vmul.f32 %v5581_v11, %v7387_v8  ;;  %v4079_v42 = vpop.f32.mrb[89].mxu0 }
 0x4d7   : > { %v4251_v0 = vmax.f32 %v4219_v9, 0.0  ;;  %v4152_v26 = vmul.f32 %v7387_v8, %v4079_v42  ;;  %v5582_v17 = vpop.f32.mrb[90].mxu0 }
 0x4d8   : > { %v4925_v28 = vpack.c.bf16 %v4253_v51, %v4252_v60  ;;  %v4192_v18 = vadd.f32 %v7392_v61, %v4154_v40  ;;  %v4155_v35 = vmul.f32 %v5582_v17, %v7387_v8  ;;  %v4082_v19 = vpop.f32.mrb[91].mxu0 }
 0x4d9   : > { %v4920_v20 = vpack.c.bf16 %v4251_v0, %v4250_v47  ;;  %v4190_v25 = vadd.f32 %v7392_v61, %v4152_v26  ;;  %v4153_v4 = vmul.f32 %v7387_v8, %v4082_v19  ;;  %v5998_v0 = vld [vmem:[%s6534_s11 + $0xf0] sm:$0xff]  ;;  %v6000_v19 = vld [vmem:[%s6534_s11 + $0xf8] sm:$0xff] }
 0x4da   : > { %4966 = vst [vmem:[%s7413_s10 + $0x48] sm:$0xff] %v4925_v28   ;;  %v4224_v49 = vadd.f32 %v5990_v21, %v4192_v18  ;;  %v4193_v29 = vadd.f32 %v7392_v61, %v4155_v35  ;;  %v5999_v28 = vld [vmem:[%s6534_s11 + $0xe0] sm:$0xff] }
 0x4db   : > { %4965 = vst [vmem:[%s7413_s10 + $0x40] sm:$0xff] %v4920_v20   ;;  %v4222_v24 = vadd.f32 %v5991_v55, %v4190_v25  ;;  %v4191_v56 = vadd.f32 %v7392_v61, %v4153_v4  ;;  %v6001_v25 = vld [vmem:[%s6534_s11 + $0xe8] sm:$0xff]  ;;  %s4427_s11 = scalar_lea.sflag [#allocation5], %s6530_s15 }
 0x4dc   : > { %v4225_v14 = vadd.f32 %v5992_v7, %v4193_v29  ;;  %v4256_v31 = vmax.f32 %v4224_v49, 0.0 }
 0x4dd   : > { %v4223_v30 = vadd.f32 %v5993_v58, %v4191_v56  ;;  %v5585_v32 = vpop.f32.mrb[92].mxu0  ;;  %v4254_v1 = vmax.f32 %v4222_v24, 0.0 }
 0x4de   : > { %v4257_v33 = vmax.f32 %v4225_v14, 0.0  ;;  %v4158_v62 = vmul.f32 %v5585_v32, %v7387_v8  ;;  %v4095_v34 = vpop.f32.mrb[93].mxu0 }
 0x4df   : > { %v4255_v36 = vmax.f32 %v4223_v30, 0.0  ;;  %v4156_v5 = vmul.f32 %v7387_v8, %v4095_v34  ;;  %v5586_v39 = vpop.f32.mrb[94].mxu0 }
 0x4e0   : > { %v4935_v2 = vpack.c.bf16 %v4257_v33, %v4256_v31  ;;  %v4196_v3 = vadd.f32 %v7392_v61, %v4158_v62  ;;  %v4159_v6 = vmul.f32 %v5586_v39, %v7387_v8  ;;  %v4098_v41 = vpop.f32.mrb[95].mxu0 }
 0x4e1   : > { %v4930_v43 = vpack.c.bf16 %v4255_v36, %v4254_v1  ;;  %v4194_v44 = vadd.f32 %v7392_v61, %v4156_v5  ;;  %v4157_v46 = vmul.f32 %v7387_v8, %v4098_v41 }
 0x4e2   : > { %4968 = vst [vmem:[%s7413_s10 + $0x58] sm:$0xff] %v4935_v2   ;;  %v4228_v37 = vadd.f32 %v5994_v48, %v4196_v3  ;;  %v4197_v10 = vadd.f32 %v7392_v61, %v4159_v6 }
 0x4e3   : > { %4967 = vst [vmem:[%s7413_s10 + $0x50] sm:$0xff] %v4930_v43   ;;  %v4226_v50 = vadd.f32 %v5995_v38, %v4194_v44  ;;  %v4195_v45 = vadd.f32 %v7392_v61, %v4157_v46 }
 0x4e4   : > { %v4229_v52 = vadd.f32 %v5996_v23, %v4197_v10  ;;  %v4260_v13 = vmax.f32 %v4228_v37, 0.0 }
 0x4e5   : > { %v4227_v12 = vadd.f32 %v5997_v27, %v4195_v45  ;;  %v5589_v22 = vpop.f32.mrb[96].mxu0  ;;  %v4258_v54 = vmax.f32 %v4226_v50, 0.0 }
 0x4e6   : > { %v4261_v53 = vmax.f32 %v4229_v52, 0.0  ;;  %v4162_v15 = vmul.f32 %v5589_v22, %v7387_v8  ;;  %v4111_v63 = vpop.f32.mrb[97].mxu0 }
 0x4e7   : > { %v4259_v57 = vmax.f32 %v4227_v12, 0.0  ;;  %v4160_v16 = vmul.f32 %v7387_v8, %v4111_v63  ;;  %v5590_v59 = vpop.f32.mrb[98].mxu0 }
 0x4e8   : > { %v4945_v9 = vpack.c.bf16 %v4261_v53, %v4260_v13  ;;  %v4200_v11 = vadd.f32 %v7392_v61, %v4162_v15  ;;  %v4163_v60 = vmul.f32 %v5590_v59, %v7387_v8  ;;  %v4114_v51 = vpop.f32.mrb[99].mxu0 }
 0x4e9   : > { %v4940_v40 = vpack.c.bf16 %v4259_v57, %v4258_v54  ;;  %v4198_v42 = vadd.f32 %v7392_v61, %v4160_v16  ;;  %v4161_v47 = vmul.f32 %v7387_v8, %v4114_v51 }
 0x4ea   : > { %4970 = vst [vmem:[%s7413_s10 + $0x68] sm:$0xff] %v4945_v9   ;;  %v4232_v26 = vadd.f32 %v5998_v0, %v4200_v11  ;;  %v4201_v17 = vadd.f32 %v7392_v61, %v4163_v60 }
 0x4eb   : > { %4969 = vst [vmem:[%s7413_s10 + $0x60] sm:$0xff] %v4940_v40   ;;  %v4230_v18 = vadd.f32 %v5999_v28, %v4198_v42  ;;  %v4199_v35 = vadd.f32 %v7392_v61, %v4161_v47 }
 0x4ec   : > { %v4233_v20 = vadd.f32 %v6000_v19, %v4201_v17  ;;  %v4264_v8 = vmax.f32 %v4232_v26, 0.0 }
 0x4ed   : > { %v4231_v4 = vadd.f32 %v6001_v25, %v4199_v35  ;;  %v4262_v49 = vmax.f32 %v4230_v18, 0.0 }
 0x4ee   : > { %v4265_v21 = vmax.f32 %v4233_v20, 0.0 }
 0x4ef   : > { %v4263_v29 = vmax.f32 %v4231_v4, 0.0 }
 0x4f0   : > { %v4955_v55 = vpack.c.bf16 %v4265_v21, %v4264_v8 }
 0x4f1   : > { %v4950_v61 = vpack.c.bf16 %v4263_v29, %v4262_v49 }
 0x4f2   : > { %4972 = vst [vmem:[%s7413_s10 + $0x78] sm:$0xff] %v4955_v55  }
 0x4f3   : > { %4971 = vst [vmem:[%s7413_s10 + $0x70] sm:$0xff] %v4950_v61  }
 0x4f4   : > { %6133 = shalt.err (!%p6130_p12)
}
 0x4f5   : > { %s6134_s26 = scalar_lea.hbm %s7512_s23, 2048  ;;  %s6138_s20 = scalar_lea.hbm %s7649_s1, 4096 }
 0x4f6   : > { %p6135_p0 = scmp.ne.s32.totalorder %s7512_s23, %s6134_s26  ;;  %p6139_p11 = scmp.lt.u32.totalorder %s7512_s23, %s7649_s1 }
 0x4f7   : > { %p6140_p2 = scmp.lt.u32.totalorder %s6138_s20, %s6134_s26  ;;  %p6142_p5 = scmp.lt.u32.totalorder %s6134_s26, %s7512_s23 }
 0x4f8   : > { %p6136_p4 = pnand %p6135_p0, %p7650_p10 }
 0x4f9   : > { %p6141_p1 = por %p6140_p2, %p6139_p11 }
 0x4fa   : > { %p6137_p7 = pneg %p6136_p4 }
 0x4fb   : > { %p6143_p13 = por %p6142_p5, %p6141_p1 }
 0x4fd   : > { %p6144_p3 = pnand %p6143_p13, %p6137_p7 }
 0x4ff   : > { %6147 = shalt.err (!%p6144_p3)
}
 0x500   : > { %s6223_s7 = smov 64   ;;  %s6224_s9 = smov 4  }
 0x501   : > { %5861 = dma.vmem_to_hbm [thread:$0]  (%p7650_p10), %s7514_s16, 2048, %s7512_s23, %s4427_s11, %s6223_s7, %s6223_s7, %s6224_s9  }
 0x502 PF: > { %s7651_s10 = sld [smem:[#allocation16_spill]]  ;;  %s7652_s25 = sld [smem:[#allocation24_spill]] }
 0x503   : > { %s7653_s18 = sld [smem:[#allocation20_spill]] }
 0x508   : > { %s4458_s24 = sand.u32 1, %s7651_s10   ;;  %p7654_p9 = scmp.ne.s32.totalorder %s7652_s25, 0 }
 0x509   : > { %p7655_p6 = scmp.ge.s32.totalorder %s7653_s18, 2  ;;  %s4459_s12 = scalar_lea.sflag [#allocation5], %s4458_s24 }
 0x50b   : > { %p5878_p8 = pnand %p7655_p6, %p7654_p9 }
 0x50d   : > { %6185 = dma.done.wait (!%p5878_p8), %s4459_s12, 2048  }
 0x50e   : > { %6187 = vsyncadd (!%p5878_p8), %s4459_s12, 4294965248  ;;  %s32_s26 = sadd.s32 1, %s7653_s18   ;;  %s7656_s27 = sld [smem:[#allocation17_spill]] }
 0x50f   : > { %p29_p12 = scmp.ge.s32.totalorder %s32_s26, 4   ;;  %s7657_s23 = sld [smem:[#allocation22_spill]] }
 0x510   : > { %s7658_s24 = sld [smem:[#allocation19_spill]]  ;;  %s7659_s25 = sld [smem:[#allocation21_spill]] }
 0x511   : > { %s7660_s21 = smov %s6194_s22  ;;  %31 = sbr.rel (!%p29_p12) target bundleno = 17 (0x11), region = 157 }
 0x514   : > { %s7661_s22 = smov %s7656_s27 }
 0x518   :  { %4464 = vsyncpa [#allocation4], 1 }
 0x519   :  { %4466 = vsyncpa [#allocation4 + $0x1], 1 }
 0x51a   :  { %4467 = vsyncpa [#allocation7], 1 }
 0x51b   :  { %4469 = vsyncpa [#allocation7 + $0x1], 1 }
 0x51c   :  { %4470 = vsyncpa [#allocation10], 1 }
 0x51d   :  { %4471 = vsyncpa [#allocation5], 1 }
 0x51e   :  { %4473 = vsyncpa [#allocation5 + $0x1], 1 }

</bundles_post_ra>
